<compile_context>
chip_gen: v6e
topology: v6e:2x2x1
jax: 0.10.0
libtpu: 0.0.40
codegen_flags: <defaults>
</compile_context>

<pallas_src>
import math
from functools import partial

import jax
import jax.numpy as jnp
from jax.experimental import pallas as pl
from jax.experimental.pallas import tpu as pltpu


# ----------------------------- Pallas kernel --------------------------------
def _lstm_kernel(idxlen_ref, emb_ref, w_ref, lin_ref, out_ref, *,
                 seq_len, vocab, emb_dim, hidden):
    T, V, E, H = seq_len, vocab, emb_dim, hidden
    B = idxlen_ref.shape[0]
    G = 4 * H

    idxlen = idxlen_ref[...]                              # (B, T+1) int32
    # Module quirk: sentence_length + (sentence_length == 0)  -> 0 becomes 1.
    lengths = idxlen[:, T:T + 1]
    lengths = lengths + (lengths == 0).astype(jnp.int32)  # (B, 1)

    w = w_ref[...]                                        # (E+H+1, 4H), pre-scaled
    wih = w[:E]                                           # (E, 4H)
    whh = w[E:E + H]                                      # (H, 4H)
    bias = w[E + H:E + H + 1]                             # (1, 4H) folded b_ih+b_hh

    # Fused embedding gather + input projection, hoisted off the recurrence:
    # e_proj[v] = embedding[v] @ W_ih^T (pre-scaled), lane-dense (V, 4H).
    e_proj = jnp.dot(emb_ref[...], wih, preferred_element_type=jnp.float32)
    lane_v = jax.lax.broadcasted_iota(jnp.int32, (B, V), 1)
    gx = []
    for t in range(T):
        onehot_t = (lane_v == idxlen[:, t:t + 1]).astype(jnp.float32)  # (B, V)
        gx.append(jnp.dot(onehot_t, e_proj,
                          preferred_element_type=jnp.float32) + bias)  # (B, 4H)

    # Single-tanh activation: sigmoid(z) = 0.5*tanh(z/2) + 0.5, with the i/f/o
    # gate columns already pre-scaled by 0.5 (PyTorch gate order i, f, g, o).
    lane_g = jax.lax.broadcasted_iota(jnp.int32, (B, G), 1)
    is_g = (lane_g >= 2 * H) & (lane_g < 3 * H)
    a_vec = jnp.where(is_g, 1.0, 0.5).astype(jnp.float32)
    b_vec = jnp.where(is_g, 0.0, 0.5).astype(jnp.float32)

    h = jnp.zeros((B, H), jnp.float32)
    c = jnp.zeros((B, H), jnp.float32)

    # T is small and static -> fully unrolled; only the (B,H)@(H,4H) recurrent
    # matmul + one lane-dense tanh sit on the serial critical path.
    # TODO(synk): keep W_hh MXU-resident via pltpu.matmul_push_rhs/acc_lhs/pop.
    for t in range(T):
        gates = gx[t] + jnp.dot(h, whh, preferred_element_type=jnp.float32)
        act = a_vec * jnp.tanh(gates) + b_vec             # one EUP pass + VPU FMA
        i_g = act[:, 0 * H:1 * H]
        f_g = act[:, 1 * H:2 * H]
        g_g = act[:, 2 * H:3 * H]
        o_g = act[:, 3 * H:4 * H]
        c_new = f_g * c + i_g * g_g
        h_new = o_g * jnp.tanh(c_new)
        # pack_padded_sequence semantics: freeze carry once t >= length[b].
        valid = lengths > t                               # (B, 1) bool
        h = jnp.where(valid, h_new, h)
        c = jnp.where(valid, c_new, c)

    # TODO(synk): nn.Dropout is stochastic in training; eval mode => identity.
    enc = jnp.tanh(h)                                     # (B, H)
    lin = lin_ref[...]                                    # (H+1, 128)
    out_ref[...] = (jnp.dot(enc, lin[:H],
                            preferred_element_type=jnp.float32)
                    + lin[H:H + 1])                       # lane-dense (B, 128)


# ------------------------------ wrapper --------------------------------------
def _lstm_forward(input_indices, sentence_length, weights):
    B, T = input_indices.shape
    V, E = weights["embedding"].shape
    H = weights["w_hh"].shape[1]
    C = weights["w_lin"].shape[0]
    C_PAD = 128                                           # lane-dense output

    # Pre-scale i/f/o gate columns by 0.5 for the single-tanh activation.
    gate_scale = jnp.concatenate(
        [jnp.full((2 * H,), 0.5, jnp.float32),            # i, f
         jnp.ones((H,), jnp.float32),                     # g
         jnp.full((H,), 0.5, jnp.float32)])               # o
    wih_t = weights["w_ih"].T * gate_scale                # (E, 4H)
    whh_t = weights["w_hh"].T * gate_scale                # (H, 4H)
    bias = ((weights["b_ih"] + weights["b_hh"]) * gate_scale).reshape(1, -1)
    w_pack = jnp.concatenate([wih_t, whh_t, bias], axis=0)  # (E+H+1, 4H)

    lin_pack = jnp.zeros((H + 1, C_PAD), jnp.float32)
    lin_pack = lin_pack.at[:H, :C].set(weights["w_lin"].T)
    lin_pack = lin_pack.at[H, :C].set(weights["b_lin"])

    idxlen = jnp.concatenate(
        [input_indices.astype(jnp.int32),
         sentence_length.reshape(B, 1).astype(jnp.int32)], axis=1)  # (B, T+1)

    vmem = pltpu.MemorySpace.VMEM
    out = pl.pallas_call(
        partial(_lstm_kernel, seq_len=T, vocab=V, emb_dim=E, hidden=H),
        out_shape=jax.ShapeDtypeStruct((B, C_PAD), jnp.float32),
        in_specs=[pl.BlockSpec(memory_space=vmem)] * 4,
        out_specs=pl.BlockSpec(memory_space=vmem),
    )(idxlen, weights["embedding"].astype(jnp.float32), w_pack, lin_pack)
    return out[:, :C]


lstm_module_forward = jax.jit(_lstm_forward)


# --------------------------- pure-JAX reference ------------------------------
def lstm_module_reference(input_indices, sentence_length, weights):
    lengths = sentence_length + (sentence_length == 0).astype(sentence_length.dtype)
    x = weights["embedding"][input_indices]            # (B, T, E)
    x = jnp.transpose(x, (1, 0, 2))                    # (T, B, E)
    T, B, E = x.shape
    H = weights["w_hh"].shape[1]
    wih_t, whh_t = weights["w_ih"].T, weights["w_hh"].T
    bias = weights["b_ih"] + weights["b_hh"]
    hp = jax.lax.Precision.HIGHEST

    def step(carry, inp):
        h, c = carry
        x_t, t = inp
        gates = (jnp.dot(x_t, wih_t, precision=hp)
                 + jnp.dot(h, whh_t, precision=hp) + bias)
        i_g = jax.nn.sigmoid(gates[:, 0 * H:1 * H])
        f_g = jax.nn.sigmoid(gates[:, 1 * H:2 * H])
        g_g = jnp.tanh(gates[:, 2 * H:3 * H])
        o_g = jax.nn.sigmoid(gates[:, 3 * H:4 * H])
        c_new = f_g * c + i_g * g_g
        h_new = o_g * jnp.tanh(c_new)
        valid = (t < lengths)[:, None]
        return (jnp.where(valid, h_new, h), jnp.where(valid, c_new, c)), None

    h0 = jnp.zeros((B, H), jnp.float32)
    (h_n, _), _ = jax.lax.scan(step, (h0, h0), (x, jnp.arange(T)))
    enc = jnp.tanh(h_n)
    return jnp.dot(enc, weights["w_lin"].T, precision=hp) + weights["b_lin"]


# --------------------------------- main --------------------------------------
if __name__ == "__main__":
    # params the module's __init__ implies
    VOCAB, EMB, HID, NUM_CLASSES = 50, 16, 32, 5
    BATCH, SEQ = 4, 8                                  # batch_size, sentence_length
    # bidirectional=False, dropout in eval mode

    key = jax.random.PRNGKey(0)
    ks = jax.random.split(key, 8)
    scale = 1.0 / math.sqrt(HID)

    embedding = jax.random.normal(ks[0], (VOCAB, EMB), jnp.float32)
    embedding = embedding.at[0].set(0.0)               # padding_idx=0

    weights = {
        "embedding": embedding,
        "w_ih": jax.random.uniform(ks[1], (4 * HID, EMB), jnp.float32, -scale, scale),
        "w_hh": jax.random.uniform(ks[2], (4 * HID, HID), jnp.float32, -scale, scale),
        "b_ih": jax.random.uniform(ks[3], (4 * HID,), jnp.float32, -scale, scale),
        "b_hh": jax.random.uniform(ks[4], (4 * HID,), jnp.float32, -scale, scale),
        "w_lin": jax.random.uniform(ks[5], (NUM_CLASSES, HID), jnp.float32, -scale, scale),
        "b_lin": jax.random.uniform(ks[6], (NUM_CLASSES,), jnp.float32, -scale, scale),
    }

    input_indices = jax.random.randint(ks[7], (BATCH, SEQ), 0, VOCAB, dtype=jnp.int32)
    sentence_length = jnp.array([8, 5, 0, 3], dtype=jnp.int32)  # includes 0 -> fixed to 1

    out = jax.block_until_ready(
        lstm_module_forward(input_indices, sentence_length, weights))
    ref = lstm_module_reference(input_indices, sentence_length, weights)

    assert out.shape == (BATCH, NUM_CLASSES), out.shape
    assert jnp.allclose(out, ref, atol=2e-4, rtol=2e-4), (
        f"max abs err {jnp.max(jnp.abs(out - ref))}")
    print("KERNEL_OK")
</pallas_src>

<mosaic_0001>
module attributes {stable_mosaic.version = 11 : i64} {
  func.func @_lstm_kernel(%arg0: memref<4x9xi32, #tpu.memory_space<vmem>>, %arg1: memref<50x16xf32, #tpu.memory_space<vmem>>, %arg2: memref<49x128xf32, #tpu.memory_space<vmem>>, %arg3: memref<33x128xf32, #tpu.memory_space<vmem>>, %arg4: memref<4x128xf32, #tpu.memory_space<vmem>>) attributes {dimension_semantics = [], scalar_prefetch = 0 : i64, scratch_operands = 0 : i64, tpu.core_type = #tpu.core_type<tc>} {
    %c0 = arith.constant 0 : index
    %c0_0 = arith.constant 0 : index
    %0 = vector.load %arg0[%c0, %c0_0] : memref<4x9xi32, #tpu.memory_space<vmem>>, vector<4x9xi32>
    %1 = vector.extract_strided_slice %0 {offsets = [0, 8], sizes = [4, 1], strides = [1, 1]} : vector<4x9xi32> to vector<4x1xi32>
    %c0_i32 = arith.constant 0 : i32
    %2 = vector.broadcast %c0_i32 : i32 to vector<4x1xi32>
    %3 = arith.cmpi eq, %1, %2 : vector<4x1xi32>
    %4 = arith.extui %3 : vector<4x1xi1> to vector<4x1xi32>
    %5 = arith.addi %1, %4 : vector<4x1xi32>
    %c0_1 = arith.constant 0 : index
    %c0_2 = arith.constant 0 : index
    %6 = vector.load %arg2[%c0_1, %c0_2] : memref<49x128xf32, #tpu.memory_space<vmem>>, vector<49x128xf32>
    %7 = vector.extract_strided_slice %6 {offsets = [0, 0], sizes = [16, 128], strides = [1, 1]} : vector<49x128xf32> to vector<16x128xf32>
    %8 = vector.extract_strided_slice %6 {offsets = [16, 0], sizes = [32, 128], strides = [1, 1]} : vector<49x128xf32> to vector<32x128xf32>
    %9 = vector.extract_strided_slice %6 {offsets = [48, 0], sizes = [1, 128], strides = [1, 1]} : vector<49x128xf32> to vector<1x128xf32>
    %c0_3 = arith.constant 0 : index
    %c0_4 = arith.constant 0 : index
    %10 = vector.load %arg1[%c0_3, %c0_4] : memref<50x16xf32, #tpu.memory_space<vmem>>, vector<50x16xf32>
    %cst = arith.constant dense<0.000000e+00> : vector<50x128xf32>
    %11 = tpu.matmul %10, %7, %cst {dimension_numbers = #tpu.dot_dimension_numbers<[1], [0], [0], [1], [0, 0, 1, 1], [], []>} : vector<50x16xf32>, vector<16x128xf32>, vector<50x128xf32> -> vector<50x128xf32>
    %12 = tpu.iota {dimensions = array<i32: 1>} : vector<4x50xi32>
    %13 = vector.extract_strided_slice %0 {offsets = [0, 0], sizes = [4, 1], strides = [1, 1]} : vector<4x9xi32> to vector<4x1xi32>
    %14 = vector.broadcast %13 : vector<4x1xi32> to vector<4x50xi32>
    %15 = arith.cmpi eq, %12, %14 : vector<4x50xi32>
    %16 = arith.extui %15 : vector<4x50xi1> to vector<4x50xi32>
    %17 = arith.sitofp %16 : vector<4x50xi32> to vector<4x50xf32>
    %cst_5 = arith.constant dense<0.000000e+00> : vector<4x128xf32>
    %18 = tpu.matmul %17, %11, %cst_5 {dimension_numbers = #tpu.dot_dimension_numbers<[1], [0], [0], [1], [0, 0, 1, 1], [], []>} : vector<4x50xf32>, vector<50x128xf32>, vector<4x128xf32> -> vector<4x128xf32>
    %19 = vector.broadcast %9 : vector<1x128xf32> to vector<4x128xf32>
    %20 = arith.addf %18, %19 : vector<4x128xf32>
    %21 = vector.extract_strided_slice %0 {offsets = [0, 1], sizes = [4, 1], strides = [1, 1]} : vector<4x9xi32> to vector<4x1xi32>
    %22 = vector.broadcast %21 : vector<4x1xi32> to vector<4x50xi32>
    %23 = arith.cmpi eq, %12, %22 : vector<4x50xi32>
    %24 = arith.extui %23 : vector<4x50xi1> to vector<4x50xi32>
    %25 = arith.sitofp %24 : vector<4x50xi32> to vector<4x50xf32>
    %cst_6 = arith.constant dense<0.000000e+00> : vector<4x128xf32>
    %26 = tpu.matmul %25, %11, %cst_6 {dimension_numbers = #tpu.dot_dimension_numbers<[1], [0], [0], [1], [0, 0, 1, 1], [], []>} : vector<4x50xf32>, vector<50x128xf32>, vector<4x128xf32> -> vector<4x128xf32>
    %27 = vector.broadcast %9 : vector<1x128xf32> to vector<4x128xf32>
    %28 = arith.addf %26, %27 : vector<4x128xf32>
    %29 = vector.extract_strided_slice %0 {offsets = [0, 2], sizes = [4, 1], strides = [1, 1]} : vector<4x9xi32> to vector<4x1xi32>
    %30 = vector.broadcast %29 : vector<4x1xi32> to vector<4x50xi32>
    %31 = arith.cmpi eq, %12, %30 : vector<4x50xi32>
    %32 = arith.extui %31 : vector<4x50xi1> to vector<4x50xi32>
    %33 = arith.sitofp %32 : vector<4x50xi32> to vector<4x50xf32>
    %cst_7 = arith.constant dense<0.000000e+00> : vector<4x128xf32>
    %34 = tpu.matmul %33, %11, %cst_7 {dimension_numbers = #tpu.dot_dimension_numbers<[1], [0], [0], [1], [0, 0, 1, 1], [], []>} : vector<4x50xf32>, vector<50x128xf32>, vector<4x128xf32> -> vector<4x128xf32>
    %35 = vector.broadcast %9 : vector<1x128xf32> to vector<4x128xf32>
    %36 = arith.addf %34, %35 : vector<4x128xf32>
    %37 = vector.extract_strided_slice %0 {offsets = [0, 3], sizes = [4, 1], strides = [1, 1]} : vector<4x9xi32> to vector<4x1xi32>
    %38 = vector.broadcast %37 : vector<4x1xi32> to vector<4x50xi32>
    %39 = arith.cmpi eq, %12, %38 : vector<4x50xi32>
    %40 = arith.extui %39 : vector<4x50xi1> to vector<4x50xi32>
    %41 = arith.sitofp %40 : vector<4x50xi32> to vector<4x50xf32>
    %cst_8 = arith.constant dense<0.000000e+00> : vector<4x128xf32>
    %42 = tpu.matmul %41, %11, %cst_8 {dimension_numbers = #tpu.dot_dimension_numbers<[1], [0], [0], [1], [0, 0, 1, 1], [], []>} : vector<4x50xf32>, vector<50x128xf32>, vector<4x128xf32> -> vector<4x128xf32>
    %43 = vector.broadcast %9 : vector<1x128xf32> to vector<4x128xf32>
    %44 = arith.addf %42, %43 : vector<4x128xf32>
    %45 = vector.extract_strided_slice %0 {offsets = [0, 4], sizes = [4, 1], strides = [1, 1]} : vector<4x9xi32> to vector<4x1xi32>
    %46 = vector.broadcast %45 : vector<4x1xi32> to vector<4x50xi32>
    %47 = arith.cmpi eq, %12, %46 : vector<4x50xi32>
    %48 = arith.extui %47 : vector<4x50xi1> to vector<4x50xi32>
    %49 = arith.sitofp %48 : vector<4x50xi32> to vector<4x50xf32>
    %cst_9 = arith.constant dense<0.000000e+00> : vector<4x128xf32>
    %50 = tpu.matmul %49, %11, %cst_9 {dimension_numbers = #tpu.dot_dimension_numbers<[1], [0], [0], [1], [0, 0, 1, 1], [], []>} : vector<4x50xf32>, vector<50x128xf32>, vector<4x128xf32> -> vector<4x128xf32>
    %51 = vector.broadcast %9 : vector<1x128xf32> to vector<4x128xf32>
    %52 = arith.addf %50, %51 : vector<4x128xf32>
    %53 = vector.extract_strided_slice %0 {offsets = [0, 5], sizes = [4, 1], strides = [1, 1]} : vector<4x9xi32> to vector<4x1xi32>
    %54 = vector.broadcast %53 : vector<4x1xi32> to vector<4x50xi32>
    %55 = arith.cmpi eq, %12, %54 : vector<4x50xi32>
    %56 = arith.extui %55 : vector<4x50xi1> to vector<4x50xi32>
    %57 = arith.sitofp %56 : vector<4x50xi32> to vector<4x50xf32>
    %cst_10 = arith.constant dense<0.000000e+00> : vector<4x128xf32>
    %58 = tpu.matmul %57, %11, %cst_10 {dimension_numbers = #tpu.dot_dimension_numbers<[1], [0], [0], [1], [0, 0, 1, 1], [], []>} : vector<4x50xf32>, vector<50x128xf32>, vector<4x128xf32> -> vector<4x128xf32>
    %59 = vector.broadcast %9 : vector<1x128xf32> to vector<4x128xf32>
    %60 = arith.addf %58, %59 : vector<4x128xf32>
    %61 = vector.extract_strided_slice %0 {offsets = [0, 6], sizes = [4, 1], strides = [1, 1]} : vector<4x9xi32> to vector<4x1xi32>
    %62 = vector.broadcast %61 : vector<4x1xi32> to vector<4x50xi32>
    %63 = arith.cmpi eq, %12, %62 : vector<4x50xi32>
    %64 = arith.extui %63 : vector<4x50xi1> to vector<4x50xi32>
    %65 = arith.sitofp %64 : vector<4x50xi32> to vector<4x50xf32>
    %cst_11 = arith.constant dense<0.000000e+00> : vector<4x128xf32>
    %66 = tpu.matmul %65, %11, %cst_11 {dimension_numbers = #tpu.dot_dimension_numbers<[1], [0], [0], [1], [0, 0, 1, 1], [], []>} : vector<4x50xf32>, vector<50x128xf32>, vector<4x128xf32> -> vector<4x128xf32>
    %67 = vector.broadcast %9 : vector<1x128xf32> to vector<4x128xf32>
    %68 = arith.addf %66, %67 : vector<4x128xf32>
    %69 = vector.extract_strided_slice %0 {offsets = [0, 7], sizes = [4, 1], strides = [1, 1]} : vector<4x9xi32> to vector<4x1xi32>
    %70 = vector.broadcast %69 : vector<4x1xi32> to vector<4x50xi32>
    %71 = arith.cmpi eq, %12, %70 : vector<4x50xi32>
    %72 = arith.extui %71 : vector<4x50xi1> to vector<4x50xi32>
    %73 = arith.sitofp %72 : vector<4x50xi32> to vector<4x50xf32>
    %cst_12 = arith.constant dense<0.000000e+00> : vector<4x128xf32>
    %74 = tpu.matmul %73, %11, %cst_12 {dimension_numbers = #tpu.dot_dimension_numbers<[1], [0], [0], [1], [0, 0, 1, 1], [], []>} : vector<4x50xf32>, vector<50x128xf32>, vector<4x128xf32> -> vector<4x128xf32>
    %75 = vector.broadcast %9 : vector<1x128xf32> to vector<4x128xf32>
    %76 = arith.addf %74, %75 : vector<4x128xf32>
    %77 = tpu.iota {dimensions = array<i32: 1>} : vector<4x128xi32>
    %c64_i32 = arith.constant 64 : i32
    %78 = vector.broadcast %c64_i32 : i32 to vector<4x128xi32>
    %79 = arith.cmpi sge, %77, %78 : vector<4x128xi32>
    %c96_i32 = arith.constant 96 : i32
    %80 = vector.broadcast %c96_i32 : i32 to vector<4x128xi32>
    %81 = arith.cmpi slt, %77, %80 : vector<4x128xi32>
    %82 = arith.andi %79, %81 : vector<4x128xi1>
    %cst_13 = arith.constant 1.000000e+00 : f32
    %cst_14 = arith.constant 5.000000e-01 : f32
    %83 = vector.broadcast %cst_13 : f32 to vector<4x128xf32>
    %84 = vector.broadcast %cst_14 : f32 to vector<4x128xf32>
    %85 = arith.select %82, %83, %84 : vector<4x128xi1>, vector<4x128xf32>
    %cst_15 = arith.constant 0.000000e+00 : f32
    %cst_16 = arith.constant 5.000000e-01 : f32
    %86 = vector.broadcast %cst_15 : f32 to vector<4x128xf32>
    %87 = vector.broadcast %cst_16 : f32 to vector<4x128xf32>
    %88 = arith.select %82, %86, %87 : vector<4x128xi1>, vector<4x128xf32>
    %cst_17 = arith.constant 0.000000e+00 : f32
    %89 = vector.broadcast %cst_17 : f32 to vector<4x32xf32>
    %cst_18 = arith.constant 0.000000e+00 : f32
    %90 = vector.broadcast %cst_18 : f32 to vector<4x32xf32>
    %cst_19 = arith.constant dense<0.000000e+00> : vector<4x128xf32>
    %91 = tpu.matmul %89, %8, %cst_19 {dimension_numbers = #tpu.dot_dimension_numbers<[1], [0], [0], [1], [0, 0, 1, 1], [], []>} : vector<4x32xf32>, vector<32x128xf32>, vector<4x128xf32> -> vector<4x128xf32>
    %92 = arith.addf %20, %91 : vector<4x128xf32>
    %93 = math.tanh %92 : vector<4x128xf32>
    %94 = arith.mulf %85, %93 : vector<4x128xf32>
    %95 = arith.addf %94, %88 : vector<4x128xf32>
    %96 = vector.extract_strided_slice %95 {offsets = [0, 0], sizes = [4, 32], strides = [1, 1]} : vector<4x128xf32> to vector<4x32xf32>
    %97 = vector.extract_strided_slice %95 {offsets = [0, 32], sizes = [4, 32], strides = [1, 1]} : vector<4x128xf32> to vector<4x32xf32>
    %98 = vector.extract_strided_slice %95 {offsets = [0, 64], sizes = [4, 32], strides = [1, 1]} : vector<4x128xf32> to vector<4x32xf32>
    %99 = vector.extract_strided_slice %95 {offsets = [0, 96], sizes = [4, 32], strides = [1, 1]} : vector<4x128xf32> to vector<4x32xf32>
    %100 = arith.mulf %97, %90 : vector<4x32xf32>
    %101 = arith.mulf %96, %98 : vector<4x32xf32>
    %102 = arith.addf %100, %101 : vector<4x32xf32>
    %103 = math.tanh %102 : vector<4x32xf32>
    %104 = arith.mulf %99, %103 : vector<4x32xf32>
    %c0_i32_20 = arith.constant 0 : i32
    %105 = vector.broadcast %c0_i32_20 : i32 to vector<4x1xi32>
    %106 = arith.cmpi sgt, %5, %105 : vector<4x1xi32>
    %107 = vector.shape_cast %106 : vector<4x1xi1> to vector<4x1xi1>
    %108 = vector.broadcast %107 : vector<4x1xi1> to vector<4x32xi1>
    %109 = arith.select %108, %104, %89 : vector<4x32xi1>, vector<4x32xf32>
    %110 = vector.shape_cast %106 : vector<4x1xi1> to vector<4x1xi1>
    %111 = vector.broadcast %110 : vector<4x1xi1> to vector<4x32xi1>
    %112 = arith.select %111, %102, %90 : vector<4x32xi1>, vector<4x32xf32>
    %cst_21 = arith.constant dense<0.000000e+00> : vector<4x128xf32>
    %113 = tpu.matmul %109, %8, %cst_21 {dimension_numbers = #tpu.dot_dimension_numbers<[1], [0], [0], [1], [0, 0, 1, 1], [], []>} : vector<4x32xf32>, vector<32x128xf32>, vector<4x128xf32> -> vector<4x128xf32>
    %114 = arith.addf %28, %113 : vector<4x128xf32>
    %115 = math.tanh %114 : vector<4x128xf32>
    %116 = arith.mulf %85, %115 : vector<4x128xf32>
    %117 = arith.addf %116, %88 : vector<4x128xf32>
    %118 = vector.extract_strided_slice %117 {offsets = [0, 0], sizes = [4, 32], strides = [1, 1]} : vector<4x128xf32> to vector<4x32xf32>
    %119 = vector.extract_strided_slice %117 {offsets = [0, 32], sizes = [4, 32], strides = [1, 1]} : vector<4x128xf32> to vector<4x32xf32>
    %120 = vector.extract_strided_slice %117 {offsets = [0, 64], sizes = [4, 32], strides = [1, 1]} : vector<4x128xf32> to vector<4x32xf32>
    %121 = vector.extract_strided_slice %117 {offsets = [0, 96], sizes = [4, 32], strides = [1, 1]} : vector<4x128xf32> to vector<4x32xf32>
    %122 = arith.mulf %119, %112 : vector<4x32xf32>
    %123 = arith.mulf %118, %120 : vector<4x32xf32>
    %124 = arith.addf %122, %123 : vector<4x32xf32>
    %125 = math.tanh %124 : vector<4x32xf32>
    %126 = arith.mulf %121, %125 : vector<4x32xf32>
    %c1_i32 = arith.constant 1 : i32
    %127 = vector.broadcast %c1_i32 : i32 to vector<4x1xi32>
    %128 = arith.cmpi sgt, %5, %127 : vector<4x1xi32>
    %129 = vector.shape_cast %128 : vector<4x1xi1> to vector<4x1xi1>
    %130 = vector.broadcast %129 : vector<4x1xi1> to vector<4x32xi1>
    %131 = arith.select %130, %126, %109 : vector<4x32xi1>, vector<4x32xf32>
    %132 = vector.shape_cast %128 : vector<4x1xi1> to vector<4x1xi1>
    %133 = vector.broadcast %132 : vector<4x1xi1> to vector<4x32xi1>
    %134 = arith.select %133, %124, %112 : vector<4x32xi1>, vector<4x32xf32>
    %cst_22 = arith.constant dense<0.000000e+00> : vector<4x128xf32>
    %135 = tpu.matmul %131, %8, %cst_22 {dimension_numbers = #tpu.dot_dimension_numbers<[1], [0], [0], [1], [0, 0, 1, 1], [], []>} : vector<4x32xf32>, vector<32x128xf32>, vector<4x128xf32> -> vector<4x128xf32>
    %136 = arith.addf %36, %135 : vector<4x128xf32>
    %137 = math.tanh %136 : vector<4x128xf32>
    %138 = arith.mulf %85, %137 : vector<4x128xf32>
    %139 = arith.addf %138, %88 : vector<4x128xf32>
    %140 = vector.extract_strided_slice %139 {offsets = [0, 0], sizes = [4, 32], strides = [1, 1]} : vector<4x128xf32> to vector<4x32xf32>
    %141 = vector.extract_strided_slice %139 {offsets = [0, 32], sizes = [4, 32], strides = [1, 1]} : vector<4x128xf32> to vector<4x32xf32>
    %142 = vector.extract_strided_slice %139 {offsets = [0, 64], sizes = [4, 32], strides = [1, 1]} : vector<4x128xf32> to vector<4x32xf32>
    %143 = vector.extract_strided_slice %139 {offsets = [0, 96], sizes = [4, 32], strides = [1, 1]} : vector<4x128xf32> to vector<4x32xf32>
    %144 = arith.mulf %141, %134 : vector<4x32xf32>
    %145 = arith.mulf %140, %142 : vector<4x32xf32>
    %146 = arith.addf %144, %145 : vector<4x32xf32>
    %147 = math.tanh %146 : vector<4x32xf32>
    %148 = arith.mulf %143, %147 : vector<4x32xf32>
    %c2_i32 = arith.constant 2 : i32
    %149 = vector.broadcast %c2_i32 : i32 to vector<4x1xi32>
    %150 = arith.cmpi sgt, %5, %149 : vector<4x1xi32>
    %151 = vector.shape_cast %150 : vector<4x1xi1> to vector<4x1xi1>
    %152 = vector.broadcast %151 : vector<4x1xi1> to vector<4x32xi1>
    %153 = arith.select %152, %148, %131 : vector<4x32xi1>, vector<4x32xf32>
    %154 = vector.shape_cast %150 : vector<4x1xi1> to vector<4x1xi1>
    %155 = vector.broadcast %154 : vector<4x1xi1> to vector<4x32xi1>
    %156 = arith.select %155, %146, %134 : vector<4x32xi1>, vector<4x32xf32>
    %cst_23 = arith.constant dense<0.000000e+00> : vector<4x128xf32>
    %157 = tpu.matmul %153, %8, %cst_23 {dimension_numbers = #tpu.dot_dimension_numbers<[1], [0], [0], [1], [0, 0, 1, 1], [], []>} : vector<4x32xf32>, vector<32x128xf32>, vector<4x128xf32> -> vector<4x128xf32>
    %158 = arith.addf %44, %157 : vector<4x128xf32>
    %159 = math.tanh %158 : vector<4x128xf32>
    %160 = arith.mulf %85, %159 : vector<4x128xf32>
    %161 = arith.addf %160, %88 : vector<4x128xf32>
    %162 = vector.extract_strided_slice %161 {offsets = [0, 0], sizes = [4, 32], strides = [1, 1]} : vector<4x128xf32> to vector<4x32xf32>
    %163 = vector.extract_strided_slice %161 {offsets = [0, 32], sizes = [4, 32], strides = [1, 1]} : vector<4x128xf32> to vector<4x32xf32>
    %164 = vector.extract_strided_slice %161 {offsets = [0, 64], sizes = [4, 32], strides = [1, 1]} : vector<4x128xf32> to vector<4x32xf32>
    %165 = vector.extract_strided_slice %161 {offsets = [0, 96], sizes = [4, 32], strides = [1, 1]} : vector<4x128xf32> to vector<4x32xf32>
    %166 = arith.mulf %163, %156 : vector<4x32xf32>
    %167 = arith.mulf %162, %164 : vector<4x32xf32>
    %168 = arith.addf %166, %167 : vector<4x32xf32>
    %169 = math.tanh %168 : vector<4x32xf32>
    %170 = arith.mulf %165, %169 : vector<4x32xf32>
    %c3_i32 = arith.constant 3 : i32
    %171 = vector.broadcast %c3_i32 : i32 to vector<4x1xi32>
    %172 = arith.cmpi sgt, %5, %171 : vector<4x1xi32>
    %173 = vector.shape_cast %172 : vector<4x1xi1> to vector<4x1xi1>
    %174 = vector.broadcast %173 : vector<4x1xi1> to vector<4x32xi1>
    %175 = arith.select %174, %170, %153 : vector<4x32xi1>, vector<4x32xf32>
    %176 = vector.shape_cast %172 : vector<4x1xi1> to vector<4x1xi1>
    %177 = vector.broadcast %176 : vector<4x1xi1> to vector<4x32xi1>
    %178 = arith.select %177, %168, %156 : vector<4x32xi1>, vector<4x32xf32>
    %cst_24 = arith.constant dense<0.000000e+00> : vector<4x128xf32>
    %179 = tpu.matmul %175, %8, %cst_24 {dimension_numbers = #tpu.dot_dimension_numbers<[1], [0], [0], [1], [0, 0, 1, 1], [], []>} : vector<4x32xf32>, vector<32x128xf32>, vector<4x128xf32> -> vector<4x128xf32>
    %180 = arith.addf %52, %179 : vector<4x128xf32>
    %181 = math.tanh %180 : vector<4x128xf32>
    %182 = arith.mulf %85, %181 : vector<4x128xf32>
    %183 = arith.addf %182, %88 : vector<4x128xf32>
    %184 = vector.extract_strided_slice %183 {offsets = [0, 0], sizes = [4, 32], strides = [1, 1]} : vector<4x128xf32> to vector<4x32xf32>
    %185 = vector.extract_strided_slice %183 {offsets = [0, 32], sizes = [4, 32], strides = [1, 1]} : vector<4x128xf32> to vector<4x32xf32>
    %186 = vector.extract_strided_slice %183 {offsets = [0, 64], sizes = [4, 32], strides = [1, 1]} : vector<4x128xf32> to vector<4x32xf32>
    %187 = vector.extract_strided_slice %183 {offsets = [0, 96], sizes = [4, 32], strides = [1, 1]} : vector<4x128xf32> to vector<4x32xf32>
    %188 = arith.mulf %185, %178 : vector<4x32xf32>
    %189 = arith.mulf %184, %186 : vector<4x32xf32>
    %190 = arith.addf %188, %189 : vector<4x32xf32>
    %191 = math.tanh %190 : vector<4x32xf32>
    %192 = arith.mulf %187, %191 : vector<4x32xf32>
    %c4_i32 = arith.constant 4 : i32
    %193 = vector.broadcast %c4_i32 : i32 to vector<4x1xi32>
    %194 = arith.cmpi sgt, %5, %193 : vector<4x1xi32>
    %195 = vector.shape_cast %194 : vector<4x1xi1> to vector<4x1xi1>
    %196 = vector.broadcast %195 : vector<4x1xi1> to vector<4x32xi1>
    %197 = arith.select %196, %192, %175 : vector<4x32xi1>, vector<4x32xf32>
    %198 = vector.shape_cast %194 : vector<4x1xi1> to vector<4x1xi1>
    %199 = vector.broadcast %198 : vector<4x1xi1> to vector<4x32xi1>
    %200 = arith.select %199, %190, %178 : vector<4x32xi1>, vector<4x32xf32>
    %cst_25 = arith.constant dense<0.000000e+00> : vector<4x128xf32>
    %201 = tpu.matmul %197, %8, %cst_25 {dimension_numbers = #tpu.dot_dimension_numbers<[1], [0], [0], [1], [0, 0, 1, 1], [], []>} : vector<4x32xf32>, vector<32x128xf32>, vector<4x128xf32> -> vector<4x128xf32>
    %202 = arith.addf %60, %201 : vector<4x128xf32>
    %203 = math.tanh %202 : vector<4x128xf32>
    %204 = arith.mulf %85, %203 : vector<4x128xf32>
    %205 = arith.addf %204, %88 : vector<4x128xf32>
    %206 = vector.extract_strided_slice %205 {offsets = [0, 0], sizes = [4, 32], strides = [1, 1]} : vector<4x128xf32> to vector<4x32xf32>
    %207 = vector.extract_strided_slice %205 {offsets = [0, 32], sizes = [4, 32], strides = [1, 1]} : vector<4x128xf32> to vector<4x32xf32>
    %208 = vector.extract_strided_slice %205 {offsets = [0, 64], sizes = [4, 32], strides = [1, 1]} : vector<4x128xf32> to vector<4x32xf32>
    %209 = vector.extract_strided_slice %205 {offsets = [0, 96], sizes = [4, 32], strides = [1, 1]} : vector<4x128xf32> to vector<4x32xf32>
    %210 = arith.mulf %207, %200 : vector<4x32xf32>
    %211 = arith.mulf %206, %208 : vector<4x32xf32>
    %212 = arith.addf %210, %211 : vector<4x32xf32>
    %213 = math.tanh %212 : vector<4x32xf32>
    %214 = arith.mulf %209, %213 : vector<4x32xf32>
    %c5_i32 = arith.constant 5 : i32
    %215 = vector.broadcast %c5_i32 : i32 to vector<4x1xi32>
    %216 = arith.cmpi sgt, %5, %215 : vector<4x1xi32>
    %217 = vector.shape_cast %216 : vector<4x1xi1> to vector<4x1xi1>
    %218 = vector.broadcast %217 : vector<4x1xi1> to vector<4x32xi1>
    %219 = arith.select %218, %214, %197 : vector<4x32xi1>, vector<4x32xf32>
    %220 = vector.shape_cast %216 : vector<4x1xi1> to vector<4x1xi1>
    %221 = vector.broadcast %220 : vector<4x1xi1> to vector<4x32xi1>
    %222 = arith.select %221, %212, %200 : vector<4x32xi1>, vector<4x32xf32>
    %cst_26 = arith.constant dense<0.000000e+00> : vector<4x128xf32>
    %223 = tpu.matmul %219, %8, %cst_26 {dimension_numbers = #tpu.dot_dimension_numbers<[1], [0], [0], [1], [0, 0, 1, 1], [], []>} : vector<4x32xf32>, vector<32x128xf32>, vector<4x128xf32> -> vector<4x128xf32>
    %224 = arith.addf %68, %223 : vector<4x128xf32>
    %225 = math.tanh %224 : vector<4x128xf32>
    %226 = arith.mulf %85, %225 : vector<4x128xf32>
    %227 = arith.addf %226, %88 : vector<4x128xf32>
    %228 = vector.extract_strided_slice %227 {offsets = [0, 0], sizes = [4, 32], strides = [1, 1]} : vector<4x128xf32> to vector<4x32xf32>
    %229 = vector.extract_strided_slice %227 {offsets = [0, 32], sizes = [4, 32], strides = [1, 1]} : vector<4x128xf32> to vector<4x32xf32>
    %230 = vector.extract_strided_slice %227 {offsets = [0, 64], sizes = [4, 32], strides = [1, 1]} : vector<4x128xf32> to vector<4x32xf32>
    %231 = vector.extract_strided_slice %227 {offsets = [0, 96], sizes = [4, 32], strides = [1, 1]} : vector<4x128xf32> to vector<4x32xf32>
    %232 = arith.mulf %229, %222 : vector<4x32xf32>
    %233 = arith.mulf %228, %230 : vector<4x32xf32>
    %234 = arith.addf %232, %233 : vector<4x32xf32>
    %235 = math.tanh %234 : vector<4x32xf32>
    %236 = arith.mulf %231, %235 : vector<4x32xf32>
    %c6_i32 = arith.constant 6 : i32
    %237 = vector.broadcast %c6_i32 : i32 to vector<4x1xi32>
    %238 = arith.cmpi sgt, %5, %237 : vector<4x1xi32>
    %239 = vector.shape_cast %238 : vector<4x1xi1> to vector<4x1xi1>
    %240 = vector.broadcast %239 : vector<4x1xi1> to vector<4x32xi1>
    %241 = arith.select %240, %236, %219 : vector<4x32xi1>, vector<4x32xf32>
    %242 = vector.shape_cast %238 : vector<4x1xi1> to vector<4x1xi1>
    %243 = vector.broadcast %242 : vector<4x1xi1> to vector<4x32xi1>
    %244 = arith.select %243, %234, %222 : vector<4x32xi1>, vector<4x32xf32>
    %cst_27 = arith.constant dense<0.000000e+00> : vector<4x128xf32>
    %245 = tpu.matmul %241, %8, %cst_27 {dimension_numbers = #tpu.dot_dimension_numbers<[1], [0], [0], [1], [0, 0, 1, 1], [], []>} : vector<4x32xf32>, vector<32x128xf32>, vector<4x128xf32> -> vector<4x128xf32>
    %246 = arith.addf %76, %245 : vector<4x128xf32>
    %247 = math.tanh %246 : vector<4x128xf32>
    %248 = arith.mulf %85, %247 : vector<4x128xf32>
    %249 = arith.addf %248, %88 : vector<4x128xf32>
    %250 = vector.extract_strided_slice %249 {offsets = [0, 0], sizes = [4, 32], strides = [1, 1]} : vector<4x128xf32> to vector<4x32xf32>
    %251 = vector.extract_strided_slice %249 {offsets = [0, 32], sizes = [4, 32], strides = [1, 1]} : vector<4x128xf32> to vector<4x32xf32>
    %252 = vector.extract_strided_slice %249 {offsets = [0, 64], sizes = [4, 32], strides = [1, 1]} : vector<4x128xf32> to vector<4x32xf32>
    %253 = vector.extract_strided_slice %249 {offsets = [0, 96], sizes = [4, 32], strides = [1, 1]} : vector<4x128xf32> to vector<4x32xf32>
    %254 = arith.mulf %251, %244 : vector<4x32xf32>
    %255 = arith.mulf %250, %252 : vector<4x32xf32>
    %256 = arith.addf %254, %255 : vector<4x32xf32>
    %257 = math.tanh %256 : vector<4x32xf32>
    %258 = arith.mulf %253, %257 : vector<4x32xf32>
    %c7_i32 = arith.constant 7 : i32
    %259 = vector.broadcast %c7_i32 : i32 to vector<4x1xi32>
    %260 = arith.cmpi sgt, %5, %259 : vector<4x1xi32>
    %261 = vector.shape_cast %260 : vector<4x1xi1> to vector<4x1xi1>
    %262 = vector.broadcast %261 : vector<4x1xi1> to vector<4x32xi1>
    %263 = arith.select %262, %258, %241 : vector<4x32xi1>, vector<4x32xf32>
    %264 = math.tanh %263 : vector<4x32xf32>
    %c0_28 = arith.constant 0 : index
    %c0_29 = arith.constant 0 : index
    %265 = vector.load %arg3[%c0_28, %c0_29] : memref<33x128xf32, #tpu.memory_space<vmem>>, vector<33x128xf32>
    %266 = vector.extract_strided_slice %265 {offsets = [0, 0], sizes = [32, 128], strides = [1, 1]} : vector<33x128xf32> to vector<32x128xf32>
    %cst_30 = arith.constant dense<0.000000e+00> : vector<4x128xf32>
    %267 = tpu.matmul %264, %266, %cst_30 {dimension_numbers = #tpu.dot_dimension_numbers<[1], [0], [0], [1], [0, 0, 1, 1], [], []>} : vector<4x32xf32>, vector<32x128xf32>, vector<4x128xf32> -> vector<4x128xf32>
    %268 = vector.extract_strided_slice %265 {offsets = [32, 0], sizes = [1, 128], strides = [1, 1]} : vector<33x128xf32> to vector<1x128xf32>
    %269 = vector.broadcast %268 : vector<1x128xf32> to vector<4x128xf32>
    %270 = arith.addf %267, %269 : vector<4x128xf32>
    %c0_31 = arith.constant 0 : index
    %c0_32 = arith.constant 0 : index
    %271 = vector.load %arg4[%c0_31, %c0_32] : memref<4x128xf32, #tpu.memory_space<vmem>>, vector<4x128xf32>
    tpu.vector_store %arg4[%c0_31, %c0_32], %270 {strides = array<i32>} : memref<4x128xf32, #tpu.memory_space<vmem>>, vector<4x128xf32>,
    return
  }
}

</mosaic_0001>

<bundles_post_ra>
// kernel: _lstm_forward.1
= control target key start
LH: loop header
LB: loop body
LE: loop exit
PB: predicated region body
PF: predicated region fallthrough
CT: control target
= control target key end

     0   :  { %v2238_v1 = vmov 0.0   ;;  %vm2239_vm0 = vmmov 0   ;;  %vm36_vm1 = vcmask 130048   ;;  %v2240_v4 = vmov 6   ;;  %s2808_s0 = inlined_call_operand.vmem [shape: s32[4,9], index: 0, kind: input, shape index: {}]   ;;  %s2809_s1 = inlined_call_operand.vmem [shape: f32[50,16], index: 1, kind: input, shape index: {}]   ;;  %s2810_s2 = inlined_call_operand.vmem [shape: f32[49,128], index: 2, kind: input, shape index: {}]   ;;  %s2811_s3 = inlined_call_operand.vmem [shape: f32[33,128], index: 3, kind: input, shape index: {}]   ;;  %s2812_s4 = inlined_call_operand.hbm [shape: f32[4,128], index: 4, kind: output, shape index: {}]  }
   0x1   :  { %v23_v0 = vld [vmem:[%s2810_s2 + $0x8] sm:$0xff]  ;;  %1895 = vmatprep.subr.mxu0 %v2238_v1  ;;  %v22_v2 = vld [vmem:[%s2810_s2] sm:$0xff]  ;;  %1899 = vmatprep.mubr.msk.f32.mxu0 %vm2239_vm0, %v2238_v1  ;;  %v2241_v6 = vmov 2  }
   0x2   :  { %1896 = vmatpush3.msra.mxu0 %v23_v0  ;;  %v29_v3 = vld [vmem:[%s2809_s1] sm:$0xff]  ;;  %2172 = vset.pattern.permute.xlu1 %v2240_v4 }
   0x3   :  { %1897 = vmatprep.subr.mxu0 %v2238_v1  ;;  %v2294_v5 = vld [vmem:[%s2808_s0] sm:$0xf]  ;;  %2170 = vset.pattern.permute.xlu0 %v2241_v6 }
   0x4   :  { %9 = vsyncpa [#allocation3], 0  ;;  %1898 = vmatpush3.msra.mxu0 %v22_v2  ;;  %644 = vperm.xlu1 %2172, %v2294_v5   ;;  %v30_v7 = vld [vmem:[%s2809_s1 + $0x8] sm:$0xff]  ;;  %v2242_v8 = vmov 0   ;;  %v31_v9 = vld [vmem:[%s2809_s1 + $0x10] sm:$0xff]  ;;  %v2243_v10 = vmov 4   ;;  %v158_v29 = vlaneseq }
   0x5   :  { %1900 = vmatmul.mubr.msk.f32.vlgmr.msra.gmra.mxu0 %vm36_vm1, %v29_v3  ;;  %328 = vperm.xlu0 %2170, %v2294_v5   ;;  %v32_v11 = vld [vmem:[%s2809_s1 + $0x18] sm:$0xff]  ;;  %v33_v12 = vld [vmem:[%s2809_s1 + $0x20] sm:$0xff]  ;;  %v34_v13 = vld [vmem:[%s2809_s1 + $0x28] sm:$0xff]  ;;  %vm174_vm2 = vcmask 1041408   ;;  %vm170_vm5 = vcmask 408576   ;;  %v2244_v43 = vmov 8  }
   0x6   :  { %1902 = vmatprep.mubr.msk.f32.mxu0 %vm2239_vm0, %v2238_v1  ;;  %1920 = vmatprep.subr.mxu1 %v2238_v1  ;;  %v35_v14 = vld [vmem:[%s2809_s1 + $0x30] sm:$0x3]  ;;  %v2372_v31 = vand.u32 127, %v158_v29  ;;  %v2456_v39 = vld [vmem:[%s2810_s2 + $0x28] sm:$0xff]  ;;  %v2464_v40 = vld [vmem:[%s2810_s2 + $0x20] sm:$0xff]  ;;  %vm19_vm10 = vcmp.eq.s32.totalorder %v2294_v5, 0 }
   0x7   :  { %1954 = vmatprep.subr.mxu0 %v2238_v1  ;;  %1934 = vmatprep.mubr.msk.f32.mxu1 %vm2239_vm0, %v2238_v1  ;;  %v2473_v41 = vld [vmem:[%s2810_s2 + $0x18] sm:$0xff]  ;;  %v2480_v42 = vld [vmem:[%s2810_s2 + $0x10] sm:$0xff]  ;;  %v20_v57 = vsel %vm19_vm10, 1, %v2242_v8  ;;  %v2245_v58 = vmov 0.5   ;;  %v2247_v3 = vmov 1   ;;  %s2248_s17 = smov 32  }
   0x8   :  { %2173 = vset.pattern.permute.xlu1 %v2242_v8  ;;  %v2507_v52 = vld [vmem:[%s2810_s2 + $0x30] ss:$0 sm:$0xff]  ;;  %vm801_vm8 = vcmp.ge.s32.totalorder %v2372_v31, 64  ;;  %vm802_vm9 = vcmp.lt.s32.totalorder %v2372_v31, 96  ;;  %v2517_v60 = vadd.s32 %v20_v57, %v2294_v5  ;;  %s2246_s2 = smov 64   ;;  %vm806_vm15 = vcmask 261120  }
   0x9   :  { %1903 = vmatmul.mubr.msk.f32.gmra.mxu0 %vm36_vm1, %v30_v7  ;;  %161 = vperm.xlu1 %2173, %v2294_v5   ;;  %vm803_vm11 = vmand %vm801_vm8, %vm802_vm9  ;;  %s2252_s27 = smov [#allocation2]  }
   0xa   :  { %1905 = vmatprep.mubr.msk.f32.mxu0 %vm2239_vm0, %v2238_v1  ;;  %2171 = vset.pattern.permute.xlu0 %v2243_v10  ;;  %v2514_v59 = vsel %vm803_vm11, 1.0, %v2245_v58  ;;  %v2519_v62 = vsel %vm803_vm11, 0.0, %v2245_v58  ;;  %vm901_vm12 = vcmp.gt.s32.totalorder %v2517_v60, 0  ;;  %vm1213_vm8 = vcmp.gt.s32.totalorder %v2517_v60, 3  ;;  %s1728_s28 = sshll.u32 %s2252_s27, 4  ;;  %s1729_s28 = int_to_ptr.vmem [resolvable:$true] %s1728_s28 }
   0xb   :  { %486 = vperm.xlu0 %2171, %v2294_v5   ;;  %v902_v2 = vsel %vm901_vm12, 1, %v2242_v8  ;;  %vm1317_vm10 = vcmp.gt.s32.totalorder %v2517_v60, 4  ;;  %vm1421_vm12 = vcmp.gt.s32.totalorder %v2517_v60, 5  ;;  %s2216_s29 = scalar_lea.vmem %s1729_s28, 64  ;;  %p2221_p1 = scmp.lt.s32.totalorder %s1729_s28, %s1729_s28 }
   0xc   :  { %p2217_p0 = scmp.ne.s32.totalorder %s1729_s28, %s2216_s29  ;;  %p2222_p2 = scmp.lt.s32.totalorder %s2216_s29, %s2216_s29 }
   0xd   :  { %1906 = vmatmul.mubr.msk.f32.gmra.mxu0 %vm36_vm1, %v31_v9  ;;  %2174 = vset.pattern.permute.xlu1 %v2244_v43 }
   0xe   :  { %1908 = vmatprep.mubr.msk.f32.mxu0 %vm2239_vm0, %v2238_v1  ;;  %p2223_p3 = por %p2222_p2, %p2221_p1 }
  0x10   :  { %p2224_p4 = pnand %p2223_p3, %p2217_p0 }
  0x11   :  { %1909 = vmatmul.mubr.msk.f32.gmra.mxu0 %vm36_vm1, %v32_v11 }
  0x12   :  { %1911 = vmatprep.mubr.msk.f32.mxu0 %vm2239_vm0, %v2238_v1 }
  0x15   :  { %1912 = vmatmul.mubr.msk.f32.gmra.mxu0 %vm36_vm1, %v33_v12 }
  0x16   :  { %1914 = vmatprep.mubr.msk.f32.mxu0 %vm2239_vm0, %v2238_v1 }
  0x19   :  { %1915 = vmatmul.mubr.msk.f32.gmra.mxu0 %vm36_vm1, %v34_v13 }
  0x1a   :  { %1917 = vmatprep.mubr.msk.f32.mxu0 %vm2239_vm0, %v2238_v1 }
  0x1d   :  { %1918 = vmatmul.mubr.msk.f32.gmra.mxu0 %vm36_vm1, %v35_v14  ;;  %vm1005_vm1 = vcmp.gt.s32.totalorder %v2517_v60, 1 }
  0x1e   :  { %1968 = vmatprep.mubr.msk.f32.mxu0 %vm2239_vm0, %v2238_v1 }
  0x7f   :  { %v2358_v28 = vpop.permute.xlu1 %644 }
  0x80   :  { %v329_v33 = vpop.permute.xlu0 %328  ;;  %vm646_vm7 = vcmp.eq.s32.totalorder %v2372_v31, %v2358_v28 }
  0x81   :  { %vm330_vm4 = vcmp.eq.s32.totalorder %v2372_v31, %v329_v33  ;;  %v1762_v38 = vsel %vm646_vm7, 1.0, %v2238_v1 }
  0x82   :  { %v1750_v35 = vsel %vm330_vm4, 1.0, %v2238_v1 }
  0x84   :  { %v162_v32 = vpop.permute.xlu1 %161 }
  0x85   :  { %vm163_vm3 = vcmp.eq.s32.totalorder %v2372_v31, %v162_v32 }
  0x86   :  { %v1743_v34 = vsel %vm163_vm3, 1.0, %v2238_v1  ;;  %v487_v36 = vpop.permute.xlu0 %486 }
  0x87   :  { %vm488_vm6 = vcmp.eq.s32.totalorder %v2372_v31, %v487_v36  ;;  %v1006_v36 = vsel %vm1005_vm1, 1, %v2242_v8  ;;  %vm1629_vm1 = vcmp.gt.s32.totalorder %v2517_v60, 7 }
  0x88   :  { %v1756_v37 = vsel %vm488_vm6, 1.0, %v2238_v1 }
  0xc5   :  { %v2344_v15 = vpop.f32.mrf.mxu0 }
  0xc7   :  { %v1901_v16 = vpop.f32.mrf.mxu0 }
  0xc9   :  { %v2346_v17 = vpop.f32.mrf.mxu0 }
  0xcb   :  { %v1904_v18 = vpop.f32.mrf.mxu0 }
  0xcd   :  { %v2348_v19 = vpop.f32.mrf.mxu0 }
  0xcf   :  { %v1907_v20 = vpop.f32.mrf.mxu0 }
  0xd1   :  { %v2350_v21 = vpop.f32.mrf.mxu0 }
  0xd3   :  { %v1910_v22 = vpop.f32.mrf.mxu0 }
  0xd5   :  { %v2352_v23 = vpop.f32.mrf.mxu0 }
  0xd7   :  { %v1913_v24 = vpop.f32.mrf.mxu0 }
  0xd9   :  { %v2354_v25 = vpop.f32.mrf.mxu0 }
  0xdb   :  { %v1916_v26 = vpop.f32.mrf.mxu0 }
  0xdd   :  { %v2356_v27 = vpop.f32.mrf.mxu0 }
  0xde   :  { %1921 = vmatpush3.msk.msra.mxu1 %vm174_vm2, %v2356_v27  ;;  %1955 = vmatpush3.msk.msra.mxu0 %vm174_vm2, %v2356_v27 }
  0xdf   :  { %v1919_v30 = vpop.f32.mrf.mxu0  ;;  %1922 = vmatprep.subr.mxu1 %v2238_v1  ;;  %1956 = vmatprep.subr.mxu0 %v2238_v1 }
  0xe0   :  { %1923 = vmatpush3.msra.mxu1 %v2354_v25  ;;  %1957 = vmatpush3.msra.mxu0 %v2354_v25 }
  0xe1   :  { %1924 = vmatprep.subr.mxu1 %v2238_v1  ;;  %1958 = vmatprep.subr.mxu0 %v2238_v1 }
  0xe2   :  { %1925 = vmatpush3.msra.mxu1 %v2352_v23  ;;  %1959 = vmatpush3.msra.mxu0 %v2352_v23 }
  0xe3   :  { %1926 = vmatprep.subr.mxu1 %v2238_v1  ;;  %1960 = vmatprep.subr.mxu0 %v2238_v1 }
  0xe4   :  { %1927 = vmatpush3.msra.mxu1 %v2350_v21  ;;  %1961 = vmatpush3.msra.mxu0 %v2350_v21 }
  0xe5   :  { %1928 = vmatprep.subr.mxu1 %v2238_v1  ;;  %1962 = vmatprep.subr.mxu0 %v2238_v1 }
  0xe6   :  { %1929 = vmatpush3.msra.mxu1 %v2348_v19  ;;  %1963 = vmatpush3.msra.mxu0 %v2348_v19 }
  0xe7   :  { %1930 = vmatprep.subr.mxu1 %v2238_v1  ;;  %1964 = vmatprep.subr.mxu0 %v2238_v1 }
  0xe8   :  { %1931 = vmatpush3.msra.mxu1 %v2346_v17  ;;  %1965 = vmatpush3.msra.mxu0 %v2346_v17 }
  0xe9   :  { %1932 = vmatprep.subr.mxu1 %v2238_v1  ;;  %1966 = vmatprep.subr.mxu0 %v2238_v1 }
  0xea   :  { %1933 = vmatpush3.msra.mxu1 %v2344_v15  ;;  %1967 = vmatpush3.msra.mxu0 %v2344_v15 }
  0xeb   :  { %1937 = vmatprep.subr.mxu1 %v2238_v1  ;;  %1988 = vmatprep.subr.mxu0 %v2238_v1 }
  0xec   :  { %1935 = vmatmul.mubr.msk.f32.vlgmr.msra.gmra.mxu1 %vm170_vm5, %v1743_v34  ;;  %1969 = vmatmul.mubr.msk.f32.vlgmr.msra.gmra.mxu0 %vm170_vm5, %v1750_v35 }
  0xed   :  { %1938 = vmatpush3.msk.msra.mxu1 %vm174_vm2, %v2356_v27  ;;  %1989 = vmatpush3.msk.msra.mxu0 %vm174_vm2, %v2356_v27 }
  0xee   :  { %1939 = vmatprep.subr.mxu1 %v2238_v1  ;;  %1990 = vmatprep.subr.mxu0 %v2238_v1 }
  0xef   :  { %1940 = vmatpush3.msra.mxu1 %v2354_v25  ;;  %1991 = vmatpush3.msra.mxu0 %v2354_v25 }
  0xf0   :  { %1941 = vmatprep.subr.mxu1 %v2238_v1  ;;  %1992 = vmatprep.subr.mxu0 %v2238_v1 }
  0xf1   :  { %1942 = vmatpush3.msra.mxu1 %v2352_v23  ;;  %1993 = vmatpush3.msra.mxu0 %v2352_v23 }
  0xf2   :  { %1943 = vmatprep.subr.mxu1 %v2238_v1  ;;  %1994 = vmatprep.subr.mxu0 %v2238_v1 }
  0xf3   :  { %1944 = vmatpush3.msra.mxu1 %v2350_v21  ;;  %1995 = vmatpush3.msra.mxu0 %v2350_v21 }
  0xf4   :  { %1945 = vmatprep.subr.mxu1 %v2238_v1  ;;  %1996 = vmatprep.subr.mxu0 %v2238_v1 }
  0xf5   :  { %1946 = vmatpush3.msra.mxu1 %v2348_v19  ;;  %1997 = vmatpush3.msra.mxu0 %v2348_v19 }
  0xf6   :  { %1947 = vmatprep.subr.mxu1 %v2238_v1  ;;  %1998 = vmatprep.subr.mxu0 %v2238_v1 }
  0xf7   :  { %1948 = vmatpush3.msra.mxu1 %v2346_v17  ;;  %1999 = vmatpush3.msra.mxu0 %v2346_v17 }
  0xf8   :  { %1949 = vmatprep.subr.mxu1 %v2238_v1  ;;  %2000 = vmatprep.subr.mxu0 %v2238_v1 }
  0xf9   :  { %1950 = vmatpush3.msra.mxu1 %v2344_v15  ;;  %2001 = vmatpush3.msra.mxu0 %v2344_v15 }
  0xfa   :  { %2002 = vmatprep.mubr.msk.f32.mxu0 %vm2239_vm0, %v2238_v1  ;;  %2022 = vmatprep.subr.mxu0 %v2238_v1 }
  0xfb   :  { %2003 = vmatmul.mubr.msk.f32.vlgmr.msra.gmra.mxu0 %vm170_vm5, %v1756_v37  ;;  %1951 = vmatprep.mubr.msk.f32.mxu1 %vm2239_vm0, %v2238_v1  ;;  %v2249_v37 = vmov 3  }
  0xfc   :  { %2023 = vmatpush3.msk.msra.mxu0 %vm174_vm2, %v2356_v27  ;;  %2036 = vmatprep.mubr.msk.f32.mxu0 %vm2239_vm0, %v2238_v1 }
  0xfd   :  { %2024 = vmatprep.subr.mxu0 %v2238_v1  ;;  %1971 = vmatprep.subr.mxu1 %v2238_v1 }
  0xfe   :  { %2025 = vmatpush3.msra.mxu0 %v2354_v25 }
  0xff   :  { %2026 = vmatprep.subr.mxu0 %v2238_v1 }
 0x100   :  { %2027 = vmatpush3.msra.mxu0 %v2352_v23 }
 0x101   :  { %2028 = vmatprep.subr.mxu0 %v2238_v1 }
 0x102   :  { %2029 = vmatpush3.msra.mxu0 %v2350_v21 }
 0x103   :  { %2030 = vmatprep.subr.mxu0 %v2238_v1 }
 0x104   :  { %2031 = vmatpush3.msra.mxu0 %v2348_v19 }
 0x105   :  { %2032 = vmatprep.subr.mxu0 %v2238_v1 }
 0x106   :  { %2033 = vmatpush3.msra.mxu0 %v2346_v17 }
 0x107   :  { %2034 = vmatprep.subr.mxu0 %v2238_v1 }
 0x108   :  { %2035 = vmatpush3.msra.mxu0 %v2344_v15 }
 0x109   :  { %2056 = vmatprep.subr.mxu0 %v2238_v1  ;;  %2037 = vmatmul.mubr.msk.f32.vlgmr.msra.gmra.mxu0 %vm170_vm5, %v1762_v38 }
 0x10a   :  { %2057 = vmatpush3.msra.mxu0 %v2456_v39  ;;  %2064 = vmatprep.mubr.msk.f32.mxu0 %vm2239_vm0, %v2238_v1 }
 0x10b   :  { %2058 = vmatprep.subr.mxu0 %v2238_v1 }
 0x10c   :  { %2059 = vmatpush3.msra.mxu0 %v2464_v40 }
 0x10d   :  { %2060 = vmatprep.subr.mxu0 %v2238_v1 }
 0x10e   :  { %2061 = vmatpush3.msra.mxu0 %v2473_v41 }
 0x10f   :  { %2062 = vmatprep.subr.mxu0 %v2238_v1 }
 0x110   :  { %2063 = vmatpush3.msra.mxu0 %v2480_v42 }
 0x111   :  { %2065 = vmatmul.mubr.f32.vlgmr.msra.gmra.mxu0 %v2238_v1  ;;  %2067 = vmatprep.subr.mxu0 %v2238_v1 }
 0x112   :  { %2068 = vmatpush3.msra.mxu0 %v2456_v39  ;;  %2075 = vmatprep.mubr.msk.f32.mxu0 %vm2239_vm0, %v2238_v1 }
 0x113   :  { %2069 = vmatprep.subr.mxu0 %v2238_v1 }
 0x114   :  { %2070 = vmatpush3.msra.mxu0 %v2464_v40 }
 0x115   :  { %2071 = vmatprep.subr.mxu0 %v2238_v1 }
 0x116   :  { %2072 = vmatpush3.msra.mxu0 %v2473_v41 }
 0x117   :  { %2073 = vmatprep.subr.mxu0 %v2238_v1 }
 0x118   :  { %2074 = vmatpush3.msra.mxu0 %v2480_v42 }
 0x119   :  { %2089 = vmatprep.subr.mxu0 %v2238_v1 }
 0x1ac   :  { %v2498_v44 = vpop.f32.mrf.mxu0  ;;  %v244_v45 = vpop.f32.mrf.mxu1 }
 0x1ad   :  { %v245_v53 = vadd.f32 %v2507_v52, %v244_v45 }
 0x1ae   :  { %v1970_v46 = vpop.f32.mrf.mxu0  ;;  %v1936_v47 = vpop.f32.mrf.mxu1 }
 0x1af   :  { %v2250_v46 = vmov 5   ;;  %v2251_v47 = vmov 7  }
 0x1b0   :  { %2178 = vset.pattern.permute.xlu0 %v2250_v46 }
 0x1bb   :  { %v2500_v48 = vpop.f32.mrf.mxu0 }
 0x1bd   :  { %v2004_v49 = vpop.f32.mrf.mxu0 }
 0x1c9   :  { %v2502_v50 = vpop.f32.mrf.mxu0 }
 0x1cb   :  { %v2038_v51 = vpop.f32.mrf.mxu0 }
 0x1d1   :  { %v876_v54 = vpop.f32.mrf.mxu0 }
 0x1d2   :  { %v880_v55 = vadd.f32 %v876_v54, %v245_v53 }
 0x1d3   :  { %v2066_v56 = vpop.f32.mrf.mxu0 }
 0x1d4   :  { %2182 = vtanh.f32 %v880_v55 }
 0x1e1   :  { %v2183_v61 = vpop.eup %2182 }
 0x1e2   :  { %v882_v63 = vmul.f32 %v2183_v61, %v2514_v59 }
 0x1e4   :  { %v883_v0 = vadd.f32 %v882_v63, %v2519_v62 }
 0x1e6   :  { %886 = vrot.lane.b32.xlu1 %v883_v0, %s2246_s2  ;;  %v884_v11 = vmul.f32 0.0, %v883_v0 }
 0x1ea   :  { %904 = vperm.xlu1 %2174, %v902_v2  }
 0x1ee   :  { %2175 = vset.pattern.permute.xlu1 %v2247_v3 }
 0x1ef   :  { %249 = vperm.xlu1 %2175, %v2294_v5  }
 0x1f3   :  { %2176 = vset.pattern.permute.xlu1 %v2244_v43 }
 0x258   :  { %v887_v4 = vpop.permute.xlu1 %886 }
 0x259   :  { %v889_v6 = vmul.f32 %v887_v4, %v883_v0 }
 0x25b   :  { %891 = vrot.lane.b32.xlu0 %v889_v6, %s2248_s17 }
 0x265   :  { %v2529_v7 = vpop.permute.xlu1 %904 }
 0x266   :  { %vm906_vm14 = vcmp.eq.s32.totalorder %v2529_v7, 1 }
 0x26a   :  { %v250_v9 = vpop.permute.xlu1 %249 }
 0x26b   :  { %vm251_vm13 = vcmp.eq.s32.totalorder %v2372_v31, %v250_v9 }
 0x26c   :  { %v1747_v10 = vsel %vm251_vm13, 1.0, %v2238_v1 }
 0x26d   :  { %1952 = vmatmul.mubr.msk.f32.vlgmr.msra.gmra.mxu1 %vm170_vm5, %v1747_v10 }
 0x26e   :  { %1972 = vmatpush3.msk.msra.mxu1 %vm174_vm2, %v2356_v27  ;;  %1985 = vmatprep.mubr.msk.f32.mxu1 %vm2239_vm0, %v2238_v1 }
 0x26f   :  { %1973 = vmatprep.subr.mxu1 %v2238_v1 }
 0x270   :  { %1974 = vmatpush3.msra.mxu1 %v2354_v25 }
 0x271   :  { %1975 = vmatprep.subr.mxu1 %v2238_v1 }
 0x272   :  { %1976 = vmatpush3.msra.mxu1 %v2352_v23 }
 0x273   :  { %1977 = vmatprep.subr.mxu1 %v2238_v1 }
 0x274   :  { %1978 = vmatpush3.msra.mxu1 %v2350_v21 }
 0x275   :  { %1979 = vmatprep.subr.mxu1 %v2238_v1 }
 0x276   :  { %1980 = vmatpush3.msra.mxu1 %v2348_v19 }
 0x277   :  { %1981 = vmatprep.subr.mxu1 %v2238_v1 }
 0x278   :  { %1982 = vmatpush3.msra.mxu1 %v2346_v17 }
 0x279   :  { %1983 = vmatprep.subr.mxu1 %v2238_v1 }
 0x27a   :  { %1984 = vmatpush3.msra.mxu1 %v2344_v15 }
 0x27b   :  { %2005 = vmatprep.subr.mxu1 %v2238_v1 }
 0x2cd   :  { %v892_v12 = vpop.permute.xlu0 %891 }
 0x2ce   :  { %v2551_v13 = vadd.f32 %v892_v12, %v884_v11 }
 0x2d0   :  { %2184 = vtanh.f32 %v2551_v13  ;;  %v2608_v54 = vsel %vm906_vm14, %v2551_v13, 0.0 }
 0x2dd   :  { %v2185_v14 = vpop.eup %2184 }
 0x2de   :  { %897 = vrot.lane.b32.xlu0 %v2185_v14, %s2246_s2 }
 0x32d   :  { %v323_v16 = vpop.f32.mrf.mxu1 }
 0x32e   :  { %v324_v28 = vadd.f32 %v2507_v52, %v323_v16 }
 0x32f   :  { %v1953_v18 = vpop.f32.mrf.mxu1 }
 0x350   :  { %v898_v20 = vpop.permute.xlu0 %897 }
 0x351   :  { %v900_v22 = vmul.f32 %v898_v20, %v883_v0 }
 0x353   :  { %v2558_v24 = vsel %vm906_vm14, %v900_v22, 0.0  ;;  %vm1525_vm14 = vcmp.gt.s32.totalorder %v2517_v60, 6 }
 0x354   :  { %910 = vrot.lane.b32.xlu0 %v2558_v24, %s2248_s17 }
 0x3c6   :  { %v911_v26 = vpop.permute.xlu0 %910 }
 0x3c7   :  { %2076 = vmatmul.mubr.msk.f32.vlgmr.msra.gmra.mxu0 %vm806_vm15, %v911_v26 }
 0x3c8   :  { %2090 = vmatpush3.msra.mxu0 %v2456_v39  ;;  %2097 = vmatprep.mubr.msk.f32.mxu0 %vm2239_vm0, %v2238_v1 }
 0x3c9   :  { %2091 = vmatprep.subr.mxu0 %v2238_v1 }
 0x3ca   :  { %2092 = vmatpush3.msra.mxu0 %v2464_v40 }
 0x3cb   :  { %2093 = vmatprep.subr.mxu0 %v2238_v1 }
 0x3cc   :  { %2094 = vmatpush3.msra.mxu0 %v2473_v41 }
 0x3cd   :  { %2095 = vmatprep.subr.mxu0 %v2238_v1 }
 0x3ce   :  { %2096 = vmatpush3.msra.mxu0 %v2480_v42 }
 0x3cf   :  { %2111 = vmatprep.subr.mxu0 %v2238_v1 }
 0x487   :  { %v980_v29 = vpop.f32.mrf.mxu0 }
 0x488   :  { %v984_v30 = vadd.f32 %v980_v29, %v324_v28 }
 0x489   :  { %v2077_v32 = vpop.f32.mrf.mxu0 }
 0x48a   :  { %2186 = vtanh.f32 %v984_v30 }
 0x497   :  { %v2187_v33 = vpop.eup %2186 }
 0x498   :  { %v986_v34 = vmul.f32 %v2187_v33, %v2514_v59 }
 0x49a   :  { %v987_v35 = vadd.f32 %v986_v34, %v2519_v62 }
 0x49c   :  { %990 = vrot.lane.b32.xlu1 %v987_v35, %s2246_s2  ;;  %v988_v55 = vmul.f32 %v987_v35, %v2608_v54 }
 0x4a0   :  { %1008 = vperm.xlu1 %2176, %v1006_v36  }
 0x4a4   :  { %2177 = vset.pattern.permute.xlu1 %v2249_v37 }
 0x4a5   :  { %407 = vperm.xlu1 %2177, %v2294_v5  }
 0x4a9   :  { %2179 = vset.pattern.permute.xlu1 %v2251_v47 }
 0x4aa   :  { %723 = vperm.xlu1 %2179, %v2294_v5  }
 0x4ae   :  { %2181 = vset.pattern.permute.xlu1 %v2244_v43 }
 0x50e   :  { %v991_v38 = vpop.permute.xlu1 %990 }
 0x50f   :  { %v993_v45 = vmul.f32 %v991_v38, %v987_v35 }
 0x511   :  { %995 = vrot.lane.b32.xlu0 %v993_v45, %s2248_s17  ;;  %v1214_v45 = vsel %vm1213_vm8, 1, %v2242_v8 }
 0x51b   :  { %v2582_v49 = vpop.permute.xlu1 %1008 }
 0x51c   :  { %vm1010_vm4 = vcmp.eq.s32.totalorder %v2582_v49, 1 }
 0x520   :  { %v408_v51 = vpop.permute.xlu1 %407 }
 0x521   :  { %vm409_vm3 = vcmp.eq.s32.totalorder %v2372_v31, %v408_v51 }
 0x522   :  { %v1753_v53 = vsel %vm409_vm3, 1.0, %v2238_v1 }
 0x523   :  { %1986 = vmatmul.mubr.msk.f32.vlgmr.msra.gmra.mxu1 %vm170_vm5, %v1753_v53 }
 0x524   :  { %2006 = vmatpush3.msk.msra.mxu1 %vm174_vm2, %v2356_v27  ;;  %2019 = vmatprep.mubr.msk.f32.mxu1 %vm2239_vm0, %v2238_v1 }
 0x525   :  { %2007 = vmatprep.subr.mxu1 %v2238_v1 }
 0x526   :  { %2008 = vmatpush3.msra.mxu1 %v2354_v25 }
 0x527   :  { %2009 = vmatprep.subr.mxu1 %v2238_v1 }
 0x528   :  { %2010 = vmatpush3.msra.mxu1 %v2352_v23 }
 0x529   :  { %2011 = vmatprep.subr.mxu1 %v2238_v1 }
 0x52a   :  { %2012 = vmatpush3.msra.mxu1 %v2350_v21 }
 0x52b   :  { %2013 = vmatprep.subr.mxu1 %v2238_v1 }
 0x52c   :  { %2014 = vmatpush3.msra.mxu1 %v2348_v19 }
 0x52d   :  { %2015 = vmatprep.subr.mxu1 %v2238_v1 }
 0x52e   :  { %2016 = vmatpush3.msra.mxu1 %v2346_v17 }
 0x52f   :  { %2017 = vmatprep.subr.mxu1 %v2238_v1 }
 0x530   :  { %2018 = vmatpush3.msra.mxu1 %v2344_v15 }
 0x531   :  { %2039 = vmatprep.subr.mxu1 %v2238_v1 }
 0x583   :  { %v996_v56 = vpop.permute.xlu0 %995 }
 0x584   :  { %v2611_v57 = vadd.f32 %v996_v56, %v988_v55 }
 0x586   :  { %2188 = vtanh.f32 %v2611_v57 }
 0x593   :  { %v2189_v58 = vpop.eup %2188 }
 0x594   :  { %1001 = vrot.lane.b32.xlu0 %v2189_v58, %s2246_s2 }
 0x598   :  { %565 = vperm.xlu0 %2178, %v2294_v5  }
 0x59c   :  { %2180 = vset.pattern.permute.xlu0 %v2244_v43  ;;  %v724_v43 = vpop.permute.xlu1 %723 }
 0x5e3   :  { %v2617_v61 = vpop.f32.mrf.mxu1 }
 0x5e4   :  { %v482_v32 = vadd.f32 %v2507_v52, %v2617_v61 }
 0x5e5   :  { %v1987_v63 = vpop.f32.mrf.mxu1 }
 0x606   :  { %v1002_v0 = vpop.permute.xlu0 %1001 }
 0x607   :  { %v1004_v2 = vmul.f32 %v1002_v0, %v987_v35  ;;  %v561_v0 = vadd.f32 %v2507_v52, %v2500_v48 }
 0x609   :  { %v2623_v3 = vsel %vm1010_vm4, %v1004_v2, %v2558_v24 }
 0x60a   :  { %1014 = vrot.lane.b32.xlu1 %v2623_v3, %s2248_s17 }
 0x613   :  { %v566_v4 = vpop.permute.xlu0 %565 }
 0x614   :  { %vm567_vm6 = vcmp.eq.s32.totalorder %v2372_v31, %v566_v4 }
 0x615   :  { %v1759_v5 = vsel %vm567_vm6, 1.0, %v2238_v1 }
 0x616   :  { %2020 = vmatmul.mubr.msk.f32.vlgmr.msra.gmra.mxu1 %vm170_vm5, %v1759_v5 }
 0x617   :  { %2040 = vmatpush3.msk.msra.mxu1 %vm174_vm2, %v2356_v27  ;;  %2053 = vmatprep.mubr.msk.f32.mxu1 %vm2239_vm0, %v2238_v1  ;;  %vm725_vm2 = vcmp.eq.s32.totalorder %v2372_v31, %v724_v43  ;;  %v403_v27 = vadd.f32 %v2507_v52, %v2498_v44  ;;  %v1012_v44 = vsel %vm1010_vm4, %v2611_v57, %v2608_v54 }
 0x618   :  { %2041 = vmatprep.subr.mxu1 %v2238_v1 }
 0x619   :  { %2042 = vmatpush3.msra.mxu1 %v2354_v25  ;;  %v1765_v25 = vsel %vm725_vm2, 1.0, %v2238_v1 }
 0x61a   :  { %2043 = vmatprep.subr.mxu1 %v2238_v1 }
 0x61b   :  { %2044 = vmatpush3.msra.mxu1 %v2352_v23 }
 0x61c   :  { %2045 = vmatprep.subr.mxu1 %v2238_v1 }
 0x61d   :  { %2046 = vmatpush3.msra.mxu1 %v2350_v21 }
 0x61e   :  { %2047 = vmatprep.subr.mxu1 %v2238_v1 }
 0x61f   :  { %2048 = vmatpush3.msra.mxu1 %v2348_v19 }
 0x620   :  { %2049 = vmatprep.subr.mxu1 %v2238_v1 }
 0x621   :  { %2050 = vmatpush3.msra.mxu1 %v2346_v17 }
 0x622   :  { %2051 = vmatprep.subr.mxu1 %v2238_v1 }
 0x623   :  { %2052 = vmatpush3.msra.mxu1 %v2344_v15 }
 0x624   :  { %2078 = vmatprep.subr.mxu1 %v2238_v1  ;;  %2054 = vmatmul.mubr.msk.f32.vlgmr.msra.gmra.mxu1 %vm170_vm5, %v1765_v25  ;;  %vm1109_vm5 = vcmp.gt.s32.totalorder %v2517_v60, 2  ;;  %v1640_v60 = vld [vmem:[%s2811_s3 + $0x18] sm:$0xff] }
 0x625   :  { %2079 = vmatpush3.msra.mxu1 %v2456_v39  ;;  %2086 = vmatprep.mubr.msk.f32.mxu1 %vm2239_vm0, %v2238_v1  ;;  %v1110_v12 = vsel %vm1109_vm5, 1, %v2242_v8 }
 0x626   :  { %2080 = vmatprep.subr.mxu1 %v2238_v1 }
 0x627   :  { %2081 = vmatpush3.msra.mxu1 %v2464_v40 }
 0x628   :  { %2082 = vmatprep.subr.mxu1 %v2238_v1 }
 0x629   :  { %2083 = vmatpush3.msra.mxu1 %v2473_v41 }
 0x62a   :  { %2084 = vmatprep.subr.mxu1 %v2238_v1 }
 0x62b   :  { %2085 = vmatpush3.msra.mxu1 %v2480_v42 }
 0x62c   :  { %2100 = vmatprep.subr.mxu1 %v2238_v1 }
 0x67c   :  { %v1015_v15 = vpop.permute.xlu1 %1014 }
 0x67d   :  { %2087 = vmatmul.mubr.msk.f32.vlgmr.msra.gmra.mxu1 %vm806_vm15, %v1015_v15  ;;  %v1318_v15 = vsel %vm1317_vm10, 1, %v2242_v8 }
 0x67e   :  { %2101 = vmatpush3.msra.mxu1 %v2456_v39  ;;  %2108 = vmatprep.mubr.msk.f32.mxu1 %vm2239_vm0, %v2238_v1 }
 0x67f   :  { %2102 = vmatprep.subr.mxu1 %v2238_v1 }
 0x680   :  { %2103 = vmatpush3.msra.mxu1 %v2464_v40 }
 0x681   :  { %2104 = vmatprep.subr.mxu1 %v2238_v1 }
 0x682   :  { %2105 = vmatpush3.msra.mxu1 %v2473_v41 }
 0x683   :  { %2106 = vmatprep.subr.mxu1 %v2238_v1 }
 0x684   :  { %2107 = vmatpush3.msra.mxu1 %v2480_v42 }
 0x685   :  { %2122 = vmatprep.subr.mxu1 %v2238_v1 }
 0x6d6   :  { %v2671_v17 = vpop.f32.mrf.mxu1 }
 0x6d8   :  { %v2021_v19 = vpop.f32.mrf.mxu1 }
 0x6e4   :  { %v2673_v21 = vpop.f32.mrf.mxu1 }
 0x6e6   :  { %v2055_v23 = vpop.f32.mrf.mxu1 }
 0x73d   :  { %v1084_v31 = vpop.f32.mrf.mxu1 }
 0x73e   :  { %v1088_v6 = vadd.f32 %v1084_v31, %v403_v27 }
 0x73f   :  { %v2088_v7 = vpop.f32.mrf.mxu1 }
 0x740   :  { %2190 = vtanh.f32 %v1088_v6 }
 0x74d   :  { %v2191_v9 = vpop.eup %2190 }
 0x74e   :  { %v1090_v10 = vmul.f32 %v2191_v9, %v2514_v59 }
 0x750   :  { %v1091_v11 = vadd.f32 %v1090_v10, %v2519_v62 }
 0x752   :  { %1094 = vrot.lane.b32.xlu0 %v1091_v11, %s2246_s2  ;;  %v1092_v16 = vmul.f32 %v1091_v11, %v1012_v44 }
 0x756   :  { %1112 = vperm.xlu0 %2180, %v1110_v12  }
 0x7c4   :  { %v1095_v13 = vpop.permute.xlu0 %1094 }
 0x7c5   :  { %v1097_v14 = vmul.f32 %v1095_v13, %v1091_v11 }
 0x7c7   :  { %1099 = vrot.lane.b32.xlu1 %v1097_v14, %s2248_s17  ;;  %v640_v14 = vadd.f32 %v2507_v52, %v2671_v17 }
 0x7d1   :  { %v1113_v24 = vpop.permute.xlu0 %1112 }
 0x7d2   :  { %vm1114_vm7 = vcmp.eq.s32.totalorder %v1113_v24, 1 }
 0x839   :  { %v1100_v18 = vpop.permute.xlu1 %1099 }
 0x83a   :  { %v1102_v20 = vadd.f32 %v1100_v18, %v1092_v16 }
 0x83c   :  { %2192 = vtanh.f32 %v1102_v20  ;;  %v1116_v49 = vsel %vm1114_vm7, %v1102_v20, %v1012_v44 }
 0x849   :  { %v2193_v22 = vpop.eup %2192 }
 0x84a   :  { %1105 = vrot.lane.b32.xlu1 %v2193_v22, %s2246_s2 }
 0x8bc   :  { %v1106_v26 = vpop.permute.xlu1 %1105 }
 0x8bd   :  { %v1108_v28 = vmul.f32 %v1106_v26, %v1091_v11 }
 0x8bf   :  { %v1115_v29 = vsel %vm1114_vm7, %v1108_v28, %v2623_v3 }
 0x8c0   :  { %1118 = vrot.lane.b32.xlu1 %v1115_v29, %s2248_s17 }
 0x932   :  { %v1119_v30 = vpop.permute.xlu1 %1118 }
 0x933   :  { %2098 = vmatmul.mubr.msk.f32.vlgmr.msra.gmra.mxu0 %vm806_vm15, %v1119_v30 }
 0x934   :  { %2112 = vmatpush3.msra.mxu0 %v2456_v39  ;;  %2119 = vmatprep.mubr.msk.f32.mxu0 %vm2239_vm0, %v2238_v1 }
 0x935   :  { %2113 = vmatprep.subr.mxu0 %v2238_v1 }
 0x936   :  { %2114 = vmatpush3.msra.mxu0 %v2464_v40 }
 0x937   :  { %2115 = vmatprep.subr.mxu0 %v2238_v1 }
 0x938   :  { %2116 = vmatpush3.msra.mxu0 %v2473_v41 }
 0x939   :  { %2117 = vmatprep.subr.mxu0 %v2238_v1 }
 0x93a   :  { %2118 = vmatpush3.msra.mxu0 %v2480_v42 }
 0x93b   :  { %2133 = vmatprep.subr.mxu0 %v2238_v1 }
 0x9f3   :  { %v1188_v33 = vpop.f32.mrf.mxu0 }
 0x9f4   :  { %v1192_v34 = vadd.f32 %v1188_v33, %v482_v32 }
 0x9f5   :  { %v2099_v35 = vpop.f32.mrf.mxu0 }
 0x9f6   :  { %2194 = vtanh.f32 %v1192_v34 }
 0xa03   :  { %v2195_v36 = vpop.eup %2194 }
 0xa04   :  { %v1194_v37 = vmul.f32 %v2195_v36, %v2514_v59  ;;  %v719_v36 = vadd.f32 %v2507_v52, %v2502_v50 }
 0xa06   :  { %v1195_v38 = vadd.f32 %v1194_v37, %v2519_v62 }
 0xa08   :  { %1198 = vrot.lane.b32.xlu0 %v1195_v38, %s2246_s2  ;;  %v1196_v51 = vmul.f32 %v1195_v38, %v1116_v49 }
 0xa0c   :  { %1216 = vperm.xlu0 %2180, %v1214_v45  }
 0xa7a   :  { %v1199_v46 = vpop.permute.xlu0 %1198 }
 0xa7b   :  { %v1201_v47 = vmul.f32 %v1199_v46, %v1195_v38 }
 0xa7d   :  { %1203 = vrot.lane.b32.xlu1 %v1201_v47, %s2248_s17 }
 0xa87   :  { %v1217_v56 = vpop.permute.xlu0 %1216 }
 0xa88   :  { %vm1218_vm9 = vcmp.eq.s32.totalorder %v1217_v56, 1 }
 0xaef   :  { %v1204_v53 = vpop.permute.xlu1 %1203 }
 0xaf0   :  { %v1206_v54 = vadd.f32 %v1204_v53, %v1196_v51  ;;  %v1526_v51 = vsel %vm1525_vm14, 1, %v2242_v8 }
 0xaf2   :  { %2196 = vtanh.f32 %v1206_v54  ;;  %v1220_v48 = vsel %vm1218_vm9, %v1206_v54, %v1116_v49 }
 0xaff   :  { %v2197_v55 = vpop.eup %2196 }
 0xb00   :  { %1209 = vrot.lane.b32.xlu1 %v2197_v55, %s2246_s2 }
 0xb72   :  { %v1210_v57 = vpop.permute.xlu1 %1209 }
 0xb73   :  { %v1212_v58 = vmul.f32 %v1210_v57, %v1195_v38 }
 0xb75   :  { %v1219_v61 = vsel %vm1218_vm9, %v1212_v58, %v1115_v29 }
 0xb76   :  { %1222 = vrot.lane.b32.xlu0 %v1219_v61, %s2248_s17 }
 0xbe8   :  { %v1223_v63 = vpop.permute.xlu0 %1222 }
 0xbe9   :  { %2109 = vmatmul.mubr.msk.f32.vlgmr.msra.gmra.mxu1 %vm806_vm15, %v1223_v63 }
 0xbea   :  { %2123 = vmatpush3.msra.mxu1 %v2456_v39  ;;  %2130 = vmatprep.mubr.msk.f32.mxu1 %vm2239_vm0, %v2238_v1 }
 0xbeb   :  { %2124 = vmatprep.subr.mxu1 %v2238_v1 }
 0xbec   :  { %2125 = vmatpush3.msra.mxu1 %v2464_v40 }
 0xbed   :  { %2126 = vmatprep.subr.mxu1 %v2238_v1 }
 0xbee   :  { %2127 = vmatpush3.msra.mxu1 %v2473_v41 }
 0xbef   :  { %2128 = vmatprep.subr.mxu1 %v2238_v1 }
 0xbf0   :  { %2129 = vmatpush3.msra.mxu1 %v2480_v42 }
 0xbf1   :  { %2144 = vmatprep.subr.mxu1 %v2238_v1 }
 0xca9   :  { %v1292_v2 = vpop.f32.mrf.mxu1 }
 0xcaa   :  { %v1296_v3 = vadd.f32 %v1292_v2, %v561_v0 }
 0xcab   :  { %v2110_v4 = vpop.f32.mrf.mxu1 }
 0xcac   :  { %2198 = vtanh.f32 %v1296_v3  ;;  %v798_v4 = vadd.f32 %v2507_v52, %v2673_v21 }
 0xcb9   :  { %v2199_v5 = vpop.eup %2198 }
 0xcba   :  { %v1298_v43 = vmul.f32 %v2199_v5, %v2514_v59 }
 0xcbc   :  { %v1299_v25 = vadd.f32 %v1298_v43, %v2519_v62 }
 0xcbe   :  { %1302 = vrot.lane.b32.xlu1 %v1299_v25, %s2246_s2  ;;  %v1300_v27 = vmul.f32 %v1299_v25, %v1220_v48 }
 0xcc2   :  { %1320 = vperm.xlu1 %2181, %v1318_v15  }
 0xd30   :  { %v1303_v19 = vpop.permute.xlu1 %1302 }
 0xd31   :  { %v1305_v23 = vmul.f32 %v1303_v19, %v1299_v25 }
 0xd33   :  { %1307 = vrot.lane.b32.xlu0 %v1305_v23, %s2248_s17 }
 0xd3d   :  { %v1321_v9 = vpop.permute.xlu1 %1320 }
 0xd3e   :  { %vm1322_vm11 = vcmp.eq.s32.totalorder %v1321_v9, 1  ;;  %v1637_v9 = vld [vmem:[%s2811_s3] sm:$0xff] }
 0xda5   :  { %v1308_v31 = vpop.permute.xlu0 %1307 }
 0xda6   :  { %v1310_v6 = vadd.f32 %v1308_v31, %v1300_v27 }
 0xda8   :  { %2200 = vtanh.f32 %v1310_v6  ;;  %v1324_v17 = vsel %vm1322_vm11, %v1310_v6, %v1220_v48  ;;  %v1630_v48 = vsel %vm1629_vm1, 1, %v2242_v8 }
 0xdb5   :  { %v2201_v7 = vpop.eup %2200 }
 0xdb6   :  { %1313 = vrot.lane.b32.xlu0 %v2201_v7, %s2246_s2 }
 0xe28   :  { %v1314_v10 = vpop.permute.xlu0 %1313 }
 0xe29   :  { %v1316_v11 = vmul.f32 %v1314_v10, %v1299_v25 }
 0xe2b   :  { %v1323_v12 = vsel %vm1322_vm11, %v1316_v11, %v1219_v61 }
 0xe2c   :  { %1326 = vrot.lane.b32.xlu1 %v1323_v12, %s2248_s17 }
 0xe9e   :  { %v1327_v13 = vpop.permute.xlu1 %1326 }
 0xe9f   :  { %2120 = vmatmul.mubr.msk.f32.vlgmr.msra.gmra.mxu0 %vm806_vm15, %v1327_v13 }
 0xea0   :  { %2134 = vmatpush3.msra.mxu0 %v2456_v39  ;;  %2141 = vmatprep.mubr.msk.f32.mxu0 %vm2239_vm0, %v2238_v1 }
 0xea1   :  { %2135 = vmatprep.subr.mxu0 %v2238_v1 }
 0xea2   :  { %2136 = vmatpush3.msra.mxu0 %v2464_v40 }
 0xea3   :  { %2137 = vmatprep.subr.mxu0 %v2238_v1 }
 0xea4   :  { %2138 = vmatpush3.msra.mxu0 %v2473_v41  ;;  %v1422_v41 = vsel %vm1421_vm12, 1, %v2242_v8  ;;  %v1639_v8 = vld [vmem:[%s2811_s3 + $0x10] sm:$0xff] }
 0xea5   :  { %2139 = vmatprep.subr.mxu0 %v2238_v1 }
 0xea6   :  { %2140 = vmatpush3.msra.mxu0 %v2480_v42 }
 0xf5f   :  { %v1396_v44 = vpop.f32.mrf.mxu0 }
 0xf60   :  { %v1400_v39 = vadd.f32 %v1396_v44, %v640_v14 }
 0xf61   :  { %v2121_v16 = vpop.f32.mrf.mxu0 }
 0xf62   :  { %2202 = vtanh.f32 %v1400_v39  ;;  %v1775_v39 = vld [vmem:[%s2811_s3 + $0x20] ss:$0 sm:$0xff] }
 0xf6f   :  { %v2203_v18 = vpop.eup %2202 }
 0xf70   :  { %v1402_v20 = vmul.f32 %v2203_v18, %v2514_v59 }
 0xf72   :  { %v1403_v40 = vadd.f32 %v1402_v20, %v2519_v62 }
 0xf74   :  { %1406 = vrot.lane.b32.xlu0 %v1403_v40, %s2246_s2  ;;  %v1404_v24 = vmul.f32 %v1403_v40, %v1324_v17 }
 0xf78   :  { %1424 = vperm.xlu0 %2180, %v1422_v41  }
 0xfe6   :  { %v1407_v42 = vpop.permute.xlu0 %1406 }
 0xfe7   :  { %v1409_v22 = vmul.f32 %v1407_v42, %v1403_v40 }
 0xfe9   :  { %1411 = vrot.lane.b32.xlu1 %v1409_v22, %s2248_s17 }
 0xff3   :  { %v1425_v30 = vpop.permute.xlu0 %1424 }
 0xff4   :  { %vm1426_vm13 = vcmp.eq.s32.totalorder %v1425_v30, 1 }
0x105b   :  { %v1412_v26 = vpop.permute.xlu1 %1411 }
0x105c   :  { %v1414_v28 = vadd.f32 %v1412_v26, %v1404_v24 }
0x105e   :  { %2204 = vtanh.f32 %v1414_v28  ;;  %v1428_v50 = vsel %vm1426_vm13, %v1414_v28, %v1324_v17 }
0x106b   :  { %v2205_v29 = vpop.eup %2204 }
0x106c   :  { %1417 = vrot.lane.b32.xlu1 %v2205_v29, %s2246_s2 }
0x10de   :  { %v1418_v32 = vpop.permute.xlu1 %1417 }
0x10df   :  { %v1420_v33 = vmul.f32 %v1418_v32, %v1403_v40 }
0x10e1   :  { %v1427_v34 = vsel %vm1426_vm13, %v1420_v33, %v1323_v12 }
0x10e2   :  { %1430 = vrot.lane.b32.xlu0 %v1427_v34, %s2248_s17 }
0x1154   :  { %v1431_v35 = vpop.permute.xlu0 %1430 }
0x1155   :  { %2131 = vmatmul.mubr.msk.f32.vlgmr.msra.gmra.mxu1 %vm806_vm15, %v1431_v35 }
0x1156   :  { %2152 = vmatprep.mubr.msk.f32.mxu1 %vm2239_vm0, %v2238_v1  ;;  %2145 = vmatpush3.msra.mxu1 %v1640_v60 }
0x1157   :  { %2146 = vmatprep.subr.mxu1 %v2238_v1 }
0x1158   :  { %2147 = vmatpush3.msra.mxu1 %v1639_v8 }
0x1159   :  { %2148 = vmatprep.subr.mxu1 %v2238_v1 }
0x1215   :  { %v1500_v37 = vpop.f32.mrf.mxu1 }
0x1216   :  { %v1504_v38 = vadd.f32 %v1500_v37, %v719_v36 }
0x1217   :  { %v2132_v45 = vpop.f32.mrf.mxu1 }
0x1218   :  { %2206 = vtanh.f32 %v1504_v38 }
0x1225   :  { %v2207_v46 = vpop.eup %2206 }
0x1226   :  { %v1506_v47 = vmul.f32 %v2207_v46, %v2514_v59 }
0x1228   :  { %v1507_v49 = vadd.f32 %v1506_v47, %v2519_v62 }
0x122a   :  { %1510 = vrot.lane.b32.xlu1 %v1507_v49, %s2246_s2  ;;  %v1508_v55 = vmul.f32 %v1507_v49, %v1428_v50 }
0x122e   :  { %1528 = vperm.xlu1 %2181, %v1526_v51  }
0x129c   :  { %v1511_v53 = vpop.permute.xlu1 %1510 }
0x129d   :  { %v1513_v54 = vmul.f32 %v1511_v53, %v1507_v49 }
0x129f   :  { %1515 = vrot.lane.b32.xlu0 %v1513_v54, %s2248_s17 }
0x12a9   :  { %v1529_v61 = vpop.permute.xlu1 %1528 }
0x12aa   :  { %vm1530_vm0 = vcmp.eq.s32.totalorder %v1529_v61, 1 }
0x1311   :  { %v1516_v56 = vpop.permute.xlu0 %1515 }
0x1312   :  { %v1518_v57 = vadd.f32 %v1516_v56, %v1508_v55 }
0x1314   :  { %2208 = vtanh.f32 %v1518_v57  ;;  %v1532_v52 = vsel %vm1530_vm0, %v1518_v57, %v1428_v50 }
0x1321   :  { %v2209_v58 = vpop.eup %2208 }
0x1322   :  { %1521 = vrot.lane.b32.xlu0 %v2209_v58, %s2246_s2 }
0x1394   :  { %v1522_v63 = vpop.permute.xlu0 %1521 }
0x1395   :  { %v1524_v0 = vmul.f32 %v1522_v63, %v1507_v49 }
0x1397   :  { %v1531_v2 = vsel %vm1530_vm0, %v1524_v0, %v1427_v34 }
0x1398   :  { %1534 = vrot.lane.b32.xlu1 %v1531_v2, %s2248_s17 }
0x140a   :  { %v1535_v3 = vpop.permute.xlu1 %1534 }
0x140b   :  { %2142 = vmatmul.mubr.msk.f32.vlgmr.msra.gmra.mxu0 %vm806_vm15, %v1535_v3 }
0x14cb   :  { %v1604_v5 = vpop.f32.mrf.mxu0 }
0x14cc   :  { %v1608_v43 = vadd.f32 %v1604_v5, %v798_v4 }
0x14cd   :  { %v2143_v25 = vpop.f32.mrf.mxu0 }
0x14ce   :  { %2210 = vtanh.f32 %v1608_v43 }
0x14db   :  { %v2211_v15 = vpop.eup %2210 }
0x14dc   :  { %v1610_v19 = vmul.f32 %v2211_v15, %v2514_v59 }
0x14de   :  { %v1611_v23 = vadd.f32 %v1610_v19, %v2519_v62  ;;  %v1638_v62 = vld [vmem:[%s2811_s3 + $0x8] sm:$0xff] }
0x14df   :  { %2149 = vmatpush3.msra.mxu1 %v1638_v62 }
0x14e0   :  { %1614 = vrot.lane.b32.xlu0 %v1611_v23, %s2246_s2  ;;  %v1612_v21 = vmul.f32 %v1611_v23, %v1532_v52  ;;  %2150 = vmatprep.subr.mxu1 %v2238_v1 }
0x14e1   :  { %2151 = vmatpush3.msra.mxu1 %v1637_v9 }
0x14e4   :  { %1632 = vperm.xlu0 %2180, %v1630_v48  }
0x1552   :  { %v1615_v27 = vpop.permute.xlu0 %1614 }
0x1553   :  { %v1617_v31 = vmul.f32 %v1615_v27, %v1611_v23 }
0x1555   :  { %1619 = vrot.lane.b32.xlu1 %v1617_v31, %s2248_s17 }
0x155f   :  { %v1633_v10 = vpop.permute.xlu0 %1632 }
0x1560   :  { %vm1634_vm3 = vcmp.eq.s32.totalorder %v1633_v10, 1 }
0x15c7   :  { %v1620_v6 = vpop.permute.xlu1 %1619 }
0x15c8   :  { %v1622_v7 = vadd.f32 %v1620_v6, %v1612_v21 }
0x15ca   :  { %2212 = vtanh.f32 %v1622_v7 }
0x15d7   :  { %v2213_v59 = vpop.eup %2212 }
0x15d8   :  { %1625 = vrot.lane.b32.xlu1 %v2213_v59, %s2246_s2 }
0x164a   :  { %v1626_v11 = vpop.permute.xlu1 %1625 }
0x164b   :  { %v1628_v12 = vmul.f32 %v1626_v11, %v1611_v23 }
0x164d   :  { %v1635_v13 = vsel %vm1634_vm3, %v1628_v12, %v1531_v2 }
0x164e   :  { %2214 = vtanh.f32 %v1635_v13 }
0x165b   :  { %v2215_v14 = vpop.eup %2214 }
0x165c   :  { %1647 = vrot.lane.b32.xlu0 %v2215_v14, %s2248_s17 }
0x16ce   :  { %v1648_v44 = vpop.permute.xlu0 %1647 }
0x16cf   :  { %2153 = vmatmul.mubr.msk.f32.vlgmr.msra.gmra.mxu1 %vm806_vm15, %v1648_v44 }
0x178f   :  { %v1717_v1 = vpop.f32.mrf.mxu1 }
0x1790   :  { %v1718_v16 = vadd.f32 %v1775_v39, %v1717_v1 }
0x1791   :  { %v2154_v18 = vpop.f32.mrf.mxu1 }
0x1792   :  { %1721 = vst [vmem:[#allocation2] sm:$0xf] %v1718_v16 }
0x1793   :  { %2227 = shalt.err (!%p2224_p4)
}
0x1794   :  { %1731 = dma.vmem_to_hbm [thread:$0]  %s1729_s28, 64, %s2812_s4, [#allocation3]  }
0x1795   :  { %2236 = dma.done.wait [#allocation3], 64  }
0x1796   :  { %2237 = vsyncadd [#allocation3], 4294967232 }
0x1797   :  { %1735 = vsyncpa [#allocation3], 1 }

</bundles_post_ra>
